<compile_context>
chip_gen: v7x
topology: tpu7x:2x2x1
jax: 0.10.0
libtpu: 0.0.40
codegen_flags: <defaults>
</compile_context>

<pallas_src>
import functools

import jax
import jax.numpy as jnp
from jax.experimental import pallas as pl
from jax.experimental.pallas import tpu as pltpu


# ------------------------------ fused kernel --------------------------------

def _stconv_block_kernel(xt_ref, gso_t_ref, w1_ref, b1_ref, ga_ref, gab_ref,
                         cw_ref, cb_ref, w2_ref, b2_ref, lng_ref, lnb_ref,
                         o_ref, *, Kt, Ks, eps):
    f32 = jnp.float32
    Bb, T1, N, KC = xt_ref.shape           # xt: conv-1 im2col, (Bb, T1, N, Kt*Cin)
    dt = xt_ref.dtype                       # matmul operand dtype (bf16-friendly)
    c0 = w1_ref.shape[1] // 2
    c1 = cw_ref.shape[1]
    c2 = w2_ref.shape[1] // 2
    T2 = T1 - Kt + 1
    M1 = Bb * T1 * N
    M2 = Bb * T2 * N

    # ---- temporal conv 1 (GLU): single MXU dot (im2col done in wrapper) ----
    # Align (zero-pad / 1x1 conv) + GLU residual already folded into w1/b1.
    acc1 = jnp.dot(xt_ref[...].reshape(M1, KC), w1_ref[...],
                   preferred_element_type=f32) + b1_ref[...].astype(f32)
    h1 = acc1[:, :c0] * jax.nn.sigmoid(acc1[:, c0:])            # (M1, c0) f32

    # ---- graph conv: align -> Chebyshev -> bias -> residual -> ReLU ----
    x_gc_in = jnp.dot(h1.astype(dt), ga_ref[...],
                      preferred_element_type=f32) + gab_ref[...].astype(f32)

    # Chebyshev recursion as plain MXU matmuls: move the node axis to lanes
    # (minor-dim transpose), z_k = 2 * z_{k-1} @ gso^T - z_{k-2}.  No broadcast
    # of gso over time is ever materialized.
    BT = Bb * T1
    z0 = jnp.transpose(x_gc_in.reshape(BT, N, c1), (0, 2, 1))   # (BT, c1, N)

    def _shift(z):                                              # one (BT*c1,N)@(N,N) dot
        return jnp.dot(z.reshape(BT * c1, N).astype(dt), gso_t_ref[...],
                       preferred_element_type=f32).reshape(BT, c1, N)

    z_terms = [z0]
    if Ks >= 2:
        z_terms.append(_shift(z0))
    for _ in range(2, Ks):
        z_terms.append(2.0 * _shift(z_terms[-1]) - z_terms[-2])

    # Concatenate the Ks orders along channels, move node back to sublanes,
    # then contract all orders with ONE dot against (Ks*c1, c1).
    zcat = jnp.transpose(jnp.concatenate(z_terms, axis=1), (0, 2, 1))  # (BT,N,Ks*c1)
    cheb = jnp.dot(zcat.reshape(M1, Ks * c1).astype(dt), cw_ref[...],
                   preferred_element_type=f32)
    h2 = jnp.maximum(x_gc_in + cheb + cb_ref[...].astype(f32), 0.0)    # ReLU

    # ---- temporal conv 2 (GLU): in-kernel im2col, single MXU dot ----
    h2_4 = h2.astype(dt).reshape(Bb, T1, N, c1)
    taps2 = jnp.concatenate(
        [h2_4[:, k:k + T2].reshape(M2, c1) for k in range(Kt)], axis=-1)
    acc2 = jnp.dot(taps2, w2_ref[...],
                   preferred_element_type=f32) + b2_ref[...].astype(f32)
    y = acc2[:, :c2] * jax.nn.sigmoid(acc2[:, c2:])              # (M2, c2) f32

    # ---- LayerNorm over (N, c2) in a lane-dense (N*c2) layout ----
    y3 = y.reshape(Bb * T2, N, c2)
    yl = jnp.concatenate([y3[:, n, :] for n in range(N)], axis=-1)  # (Bb*T2, N*c2)
    inv = 1.0 / (N * c2)
    mean = jnp.sum(yl, axis=-1, keepdims=True) * inv
    d = yl - mean
    var = jnp.sum(d * d, axis=-1, keepdims=True) * inv
    out = (d * jax.lax.rsqrt(var + eps) * lng_ref[...].astype(f32)
           + lnb_ref[...].astype(f32))
    # TODO(synk): nn.Dropout is identity here (inference); training-mode dropout
    # would need pltpu.prng_seed/prng_random_bits inside the kernel.
    o_ref[...] = out.reshape(Bb, T2, N * c2).astype(o_ref.dtype)


# ------------------------------ wrapper / glue -------------------------------

def _align_matrix(c_in, c_out, w, b, dtype):
    """Linear map implementing Align: 1x1 conv (c_in>c_out) or identity / zero-pad."""
    if c_in > c_out:
        return w.astype(dtype), b.astype(dtype)
    return jnp.eye(c_in, c_out, dtype=dtype), jnp.zeros((1, c_out), dtype)


def _prep_temporal(prm, c_in, c_out, Kt, dtype):
    """Merge p/q weights, fold Align + GLU residual into the (Kt-1) tap, flatten."""
    res_w, res_b = _align_matrix(c_in, c_out, prm.get("align_w"),
                                 prm.get("align_b"), dtype)
    w_p = prm["w_p"].astype(dtype).at[Kt - 1].add(res_w)
    b_p = prm["b_p"].astype(dtype) + res_b
    w = jnp.concatenate([w_p, prm["w_q"].astype(dtype)], axis=-1)  # (Kt, c_in, 2*c_out)
    b = jnp.concatenate([b_p, prm["b_q"].astype(dtype)], axis=-1)  # (1, 2*c_out)
    return w.reshape(Kt * c_in, 2 * c_out), b


def _pick_batch_block(B, cap=8):
    bb = min(B, cap)
    while B % bb:
        bb -= 1
    return bb


def _st_conv_block_btnc(x_btnc, params, gso, *, Kt, Ks, eps=1e-5):
    """BTNC-native STConvBlock: (B, T, N, Cin) -> (B, T-2(Kt-1), N, c2).

    Chained blocks should call this directly so activations stay in BTNC;
    NCHW conversion belongs only at model entry/exit."""
    B, T, N, Cin = x_btnc.shape
    dtype = x_btnc.dtype
    T1 = T - (Kt - 1)
    T2 = T1 - (Kt - 1)

    c0 = params["tc1"]["w_p"].shape[2]
    c1 = params["gc"]["cheb_w"].shape[2]
    c2 = params["tc2"]["w_p"].shape[2]

    # conv-1 im2col in the wrapper: denser input lanes (Kt*Cin) + one dot in-kernel.
    x_taps = jnp.concatenate([x_btnc[:, k:k + T1] for k in range(Kt)], axis=-1)

    w1, b1 = _prep_temporal(params["tc1"], Cin, c0, Kt, dtype)
    ga, gab = _align_matrix(c0, c1, params["gc"].get("align_w"),
                            params["gc"].get("align_b"), dtype)
    cw = params["gc"]["cheb_w"].astype(dtype).reshape(Ks * c1, c1)
    cb = params["gc"]["cheb_b"].astype(dtype)
    w2, b2 = _prep_temporal(params["tc2"], c1, c2, Kt, dtype)
    lng = params["ln_g"].astype(dtype).reshape(1, N * c2)
    lnb = params["ln_b"].astype(dtype).reshape(1, N * c2)
    gso_t = jnp.transpose(gso).astype(dtype)

    Bb = _pick_batch_block(B)
    kern = functools.partial(_stconv_block_kernel, Kt=Kt, Ks=Ks, eps=eps)

    out = pl.pallas_call(
        kern,
        out_shape=jax.ShapeDtypeStruct((B, T2, N * c2), dtype),
        grid=(B // Bb,),
        in_specs=[
            pl.BlockSpec((Bb, T1, N, Kt * Cin), lambda b: (b, 0, 0, 0)),
            pl.BlockSpec((N, N), lambda b: (0, 0)),
            pl.BlockSpec((Kt * Cin, 2 * c0), lambda b: (0, 0)),
            pl.BlockSpec((1, 2 * c0), lambda b: (0, 0)),
            pl.BlockSpec((c0, c1), lambda b: (0, 0)),
            pl.BlockSpec((1, c1), lambda b: (0, 0)),
            pl.BlockSpec((Ks * c1, c1), lambda b: (0, 0)),
            pl.BlockSpec((1, c1), lambda b: (0, 0)),
            pl.BlockSpec((Kt * c1, 2 * c2), lambda b: (0, 0)),
            pl.BlockSpec((1, 2 * c2), lambda b: (0, 0)),
            pl.BlockSpec((1, N * c2), lambda b: (0, 0)),
            pl.BlockSpec((1, N * c2), lambda b: (0, 0)),
        ],
        out_specs=pl.BlockSpec((Bb, T2, N * c2), lambda b: (b, 0, 0)),
        compiler_params=pltpu.CompilerParams(
            dimension_semantics=("parallel",)),
    )(x_taps, gso_t, w1, b1, ga, gab, cw, cb, w2, b2, lng, lnb)

    return out.reshape(B, T2, N, c2)


def _st_conv_block(x_nchw, params, *, Kt, Ks, gso, eps=1e-5):
    # NCHW adapter (PyTorch convention): only used at the model boundary / test.
    x = jnp.transpose(x_nchw, (0, 2, 3, 1))                      # -> BTNC
    out = _st_conv_block_btnc(x, params, gso, Kt=Kt, Ks=Ks, eps=eps)
    return jnp.transpose(out, (0, 3, 1, 2))                      # -> NCHW


st_conv_block = jax.jit(_st_conv_block, static_argnames=("Kt", "Ks", "eps"))


# ----------------------------- pure-JAX reference ----------------------------

def reference_forward(x, p, Kt, Ks, gso):
    c0, c1, c2 = p["c0"], p["c1"], p["c2"]

    def align(x, c_out, w=None, b=None):
        c_in = x.shape[1]
        if c_in > c_out:
            return jnp.einsum("bctn,co->botn", x, w) + b[0][None, :, None, None]
        if c_in < c_out:
            B, _, T, N = x.shape
            return jnp.concatenate(
                [x, jnp.zeros((B, c_out - c_in, T, N), x.dtype)], axis=1)
        return x

    def temporal(x, prm, c_out):
        B, Cin, T, N = x.shape
        T_out = T - Kt + 1
        x_in = align(x, c_out, prm.get("align_w"), prm.get("align_b"))[:, :, Kt - 1:, :]
        xp = jnp.zeros((B, c_out, T_out, N), jnp.float32)
        xq = jnp.zeros((B, c_out, T_out, N), jnp.float32)
        for k in range(Kt):
            xs = x[:, :, k:k + T_out, :]
            xp = xp + jnp.einsum("bctn,co->botn", xs, prm["w_p"][k])
            xq = xq + jnp.einsum("bctn,co->botn", xs, prm["w_q"][k])
        xp = xp + prm["b_p"][0][None, :, None, None]
        xq = xq + prm["b_q"][0][None, :, None, None]
        return (xp + x_in) * jax.nn.sigmoid(xq)

    def graph(x, prm, c_out):
        x_gc_in = align(x, c_out, prm.get("align_w"), prm.get("align_b"))
        xb = jnp.transpose(x_gc_in, (0, 2, 3, 1))
        x_list = [xb]
        if Ks >= 2:
            x_list.append(jnp.einsum("hi,btij->bthj", gso, xb))
        for k in range(2, Ks):
            x_list.append(jnp.einsum("hi,btij->bthj", 2.0 * gso, x_list[k - 1])
                          - x_list[k - 2])
        xs = jnp.stack(x_list, axis=2)
        cheb = jnp.einsum("btkhi,kij->bthj", xs, prm["cheb_w"]) + prm["cheb_b"][0]
        return jnp.transpose(cheb, (0, 3, 1, 2)) + x_gc_in

    x = temporal(x, p["tc1"], c0)
    x = jax.nn.relu(graph(x, p["gc"], c1))
    x = temporal(x, p["tc2"], c2)
    xp = jnp.transpose(x, (0, 2, 3, 1))
    mean = jnp.mean(xp, axis=(2, 3), keepdims=True)
    var = jnp.mean((xp - mean) ** 2, axis=(2, 3), keepdims=True)
    xn = (xp - mean) / jnp.sqrt(var + 1e-5)
    out = xn * p["ln_g"] + p["ln_b"]
    return jnp.transpose(out, (0, 3, 1, 2))


# ----------------------------------- main ------------------------------------

if __name__ == "__main__":
    B, T, N = 2, 8, 16
    Kt, Ks = 3, 3
    c_last = 4
    c0, c1, c2 = 16, 8, 16   # channels: exercises pad-align, conv-align, pad-align
    f32 = jnp.float32

    key = jax.random.PRNGKey(0)
    ks = jax.random.split(key, 16)

    def u(k, shape, s=0.3):
        return jax.random.uniform(k, shape, f32, -s, s)

    gso = u(ks[0], (N, N), 1.0)
    gso = (gso + gso.T) / (2.0 * N)   # symmetric graph shift operator, small scale

    params = {
        "c0": c0, "c1": c1, "c2": c2,
        "tc1": {"w_p": u(ks[1], (Kt, c_last, c0)),
                "w_q": u(ks[2], (Kt, c_last, c0)),
                "b_p": u(ks[3], (1, c0)),
                "b_q": u(ks[4], (1, c0))},
        "gc": {"align_w": u(ks[5], (c0, c1)),
               "align_b": u(ks[6], (1, c1)),
               "cheb_w": u(ks[7], (Ks, c1, c1)),
               "cheb_b": u(ks[8], (1, c1))},
        "tc2": {"w_p": u(ks[9], (Kt, c1, c2)),
                "w_q": u(ks[10], (Kt, c1, c2)),
                "b_p": u(ks[11], (1, c2)),
                "b_q": u(ks[12], (1, c2))},
        "ln_g": 1.0 + u(ks[14], (N, c2), 0.1),
        "ln_b": u(ks[15], (N, c2), 0.1),
    }

    x = jax.random.normal(ks[13], (B, c_last, T, N), f32)   # NCHW: (B, C, T, N)

    out = st_conv_block(x, params, Kt=Kt, Ks=Ks, gso=gso)
    out = jax.block_until_ready(out)

    assert out.shape == (B, c2, T - 2 * (Kt - 1), N), out.shape

    ref = reference_forward(x, params, Kt, Ks, gso)
    max_err = float(jnp.max(jnp.abs(out - ref)))
    if max_err > 1e-3:
        raise AssertionError(f"Pallas output mismatch vs reference: {max_err}")

    print("KERNEL_OK")
</pallas_src>

<mosaic_0001>
module attributes {stable_mosaic.version = 11 : i64} {
  func.func @_stconv_block_kernel(%arg0: i32, %arg1: memref<2x6x16x12xf32, #tpu.memory_space<vmem>>, %arg2: memref<16x16xf32, #tpu.memory_space<vmem>>, %arg3: memref<12x32xf32, #tpu.memory_space<vmem>>, %arg4: memref<1x32xf32, #tpu.memory_space<vmem>>, %arg5: memref<16x8xf32, #tpu.memory_space<vmem>>, %arg6: memref<1x8xf32, #tpu.memory_space<vmem>>, %arg7: memref<24x8xf32, #tpu.memory_space<vmem>>, %arg8: memref<1x8xf32, #tpu.memory_space<vmem>>, %arg9: memref<24x32xf32, #tpu.memory_space<vmem>>, %arg10: memref<1x32xf32, #tpu.memory_space<vmem>>, %arg11: memref<1x256xf32, #tpu.memory_space<vmem>>, %arg12: memref<1x256xf32, #tpu.memory_space<vmem>>, %arg13: memref<2x4x256xf32, #tpu.memory_space<vmem>>) attributes {dimension_semantics = [#tpu.dimension_semantics<parallel>], iteration_bounds = array<i64: 1>, scalar_prefetch = 0 : i64, scratch_operands = 0 : i64, tpu.core_type = #tpu.core_type<tc>, window_params = [{transform_indices = @transform_0, window_bounds = array<i64: 2, 6, 16, 12>}, {pipeline_mode = #tpu.pipeline_mode<synchronous>, transform_indices = @transform_1, window_bounds = array<i64: 16, 16>}, {pipeline_mode = #tpu.pipeline_mode<synchronous>, transform_indices = @transform_2, window_bounds = array<i64: 12, 32>}, {pipeline_mode = #tpu.pipeline_mode<synchronous>, transform_indices = @transform_3, window_bounds = array<i64: 1, 32>}, {pipeline_mode = #tpu.pipeline_mode<synchronous>, transform_indices = @transform_4, window_bounds = array<i64: 16, 8>}, {pipeline_mode = #tpu.pipeline_mode<synchronous>, transform_indices = @transform_5, window_bounds = array<i64: 1, 8>}, {pipeline_mode = #tpu.pipeline_mode<synchronous>, transform_indices = @transform_6, window_bounds = array<i64: 24, 8>}, {pipeline_mode = #tpu.pipeline_mode<synchronous>, transform_indices = @transform_7, window_bounds = array<i64: 1, 8>}, {pipeline_mode = #tpu.pipeline_mode<synchronous>, transform_indices = @transform_8, window_bounds = array<i64: 24, 32>}, {pipeline_mode = #tpu.pipeline_mode<synchronous>, transform_indices = @transform_9, window_bounds = array<i64: 1, 32>}, {pipeline_mode = #tpu.pipeline_mode<synchronous>, transform_indices = @transform_10, window_bounds = array<i64: 1, 256>}, {pipeline_mode = #tpu.pipeline_mode<synchronous>, transform_indices = @transform_11, window_bounds = array<i64: 1, 256>}, {transform_indices = @transform_12, window_bounds = array<i64: 2, 4, 256>}]} {
    %c0 = arith.constant 0 : index
    %c0_0 = arith.constant 0 : index
    %c0_1 = arith.constant 0 : index
    %c0_2 = arith.constant 0 : index
    %0 = vector.load %arg1[%c0, %c0_0, %c0_1, %c0_2] : memref<2x6x16x12xf32, #tpu.memory_space<vmem>>, vector<2x6x16x12xf32>
    %1 = vector.shape_cast %0 : vector<2x6x16x12xf32> to vector<192x12xf32>
    %c0_3 = arith.constant 0 : index
    %c0_4 = arith.constant 0 : index
    %2 = vector.load %arg3[%c0_3, %c0_4] : memref<12x32xf32, #tpu.memory_space<vmem>>, vector<12x32xf32>
    %cst = arith.constant dense<0.000000e+00> : vector<192x32xf32>
    %3 = tpu.matmul %1, %2, %cst {dimension_numbers = #tpu.dot_dimension_numbers<[1], [0], [0], [1], [0, 0, 1, 1], [], []>} : vector<192x12xf32>, vector<12x32xf32>, vector<192x32xf32> -> vector<192x32xf32>
    %c0_5 = arith.constant 0 : index
    %c0_6 = arith.constant 0 : index
    %4 = vector.load %arg4[%c0_5, %c0_6] : memref<1x32xf32, #tpu.memory_space<vmem>>, vector<1x32xf32>
    %5 = vector.broadcast %4 : vector<1x32xf32> to vector<192x32xf32>
    %6 = arith.addf %3, %5 : vector<192x32xf32>
    %7 = vector.extract_strided_slice %6 {offsets = [0, 0], sizes = [192, 16], strides = [1, 1]} : vector<192x32xf32> to vector<192x16xf32>
    %8 = vector.extract_strided_slice %6 {offsets = [0, 16], sizes = [192, 16], strides = [1, 1]} : vector<192x32xf32> to vector<192x16xf32>
    %9 = arith.negf %8 : vector<192x16xf32>
    %10 = math.exp %9 : vector<192x16xf32>
    %cst_7 = arith.constant 1.000000e+00 : f32
    %11 = vector.broadcast %cst_7 : f32 to vector<192x16xf32>
    %12 = arith.addf %11, %10 : vector<192x16xf32>
    %13 = arith.divf %11, %12 : vector<192x16xf32>
    %14 = arith.mulf %7, %13 : vector<192x16xf32>
    %c0_8 = arith.constant 0 : index
    %c0_9 = arith.constant 0 : index
    %15 = vector.load %arg5[%c0_8, %c0_9] : memref<16x8xf32, #tpu.memory_space<vmem>>, vector<16x8xf32>
    %cst_10 = arith.constant dense<0.000000e+00> : vector<192x8xf32>
    %16 = tpu.matmul %14, %15, %cst_10 {dimension_numbers = #tpu.dot_dimension_numbers<[1], [0], [0], [1], [0, 0, 1, 1], [], []>} : vector<192x16xf32>, vector<16x8xf32>, vector<192x8xf32> -> vector<192x8xf32>
    %c0_11 = arith.constant 0 : index
    %c0_12 = arith.constant 0 : index
    %17 = vector.load %arg6[%c0_11, %c0_12] : memref<1x8xf32, #tpu.memory_space<vmem>>, vector<1x8xf32>
    %18 = vector.broadcast %17 : vector<1x8xf32> to vector<192x8xf32>
    %19 = arith.addf %16, %18 : vector<192x8xf32>
    %20 = vector.shape_cast %19 : vector<192x8xf32> to vector<12x16x8xf32>
    %21 = tpu.transpose %20, [0, 2, 1] : vector<12x16x8xf32> -> vector<12x8x16xf32>
    %22 = vector.shape_cast %21 : vector<12x8x16xf32> to vector<96x16xf32>
    %c0_13 = arith.constant 0 : index
    %c0_14 = arith.constant 0 : index
    %23 = vector.load %arg2[%c0_13, %c0_14] : memref<16x16xf32, #tpu.memory_space<vmem>>, vector<16x16xf32>
    %cst_15 = arith.constant dense<0.000000e+00> : vector<96x16xf32>
    %24 = tpu.matmul %22, %23, %cst_15 {dimension_numbers = #tpu.dot_dimension_numbers<[1], [0], [0], [1], [0, 0, 1, 1], [], []>} : vector<96x16xf32>, vector<16x16xf32>, vector<96x16xf32> -> vector<96x16xf32>
    %25 = vector.shape_cast %24 : vector<96x16xf32> to vector<12x8x16xf32>
    %26 = vector.shape_cast %25 : vector<12x8x16xf32> to vector<96x16xf32>
    %c0_16 = arith.constant 0 : index
    %c0_17 = arith.constant 0 : index
    %27 = vector.load %arg2[%c0_16, %c0_17] : memref<16x16xf32, #tpu.memory_space<vmem>>, vector<16x16xf32>
    %cst_18 = arith.constant dense<0.000000e+00> : vector<96x16xf32>
    %28 = tpu.matmul %26, %27, %cst_18 {dimension_numbers = #tpu.dot_dimension_numbers<[1], [0], [0], [1], [0, 0, 1, 1], [], []>} : vector<96x16xf32>, vector<16x16xf32>, vector<96x16xf32> -> vector<96x16xf32>
    %29 = vector.shape_cast %28 : vector<96x16xf32> to vector<12x8x16xf32>
    %cst_19 = arith.constant 2.000000e+00 : f32
    %30 = vector.broadcast %cst_19 : f32 to vector<12x8x16xf32>
    %31 = arith.mulf %30, %29 : vector<12x8x16xf32>
    %32 = arith.subf %31, %21 : vector<12x8x16xf32>
    %33 = tpu.concatenate %21, %25, %32 in 1 : vector<12x8x16xf32>, vector<12x8x16xf32>, vector<12x8x16xf32> -> vector<12x24x16xf32>
    %34 = tpu.transpose %33, [0, 2, 1] : vector<12x24x16xf32> -> vector<12x16x24xf32>
    %35 = vector.shape_cast %34 : vector<12x16x24xf32> to vector<192x24xf32>
    %c0_20 = arith.constant 0 : index
    %c0_21 = arith.constant 0 : index
    %36 = vector.load %arg7[%c0_20, %c0_21] : memref<24x8xf32, #tpu.memory_space<vmem>>, vector<24x8xf32>
    %cst_22 = arith.constant dense<0.000000e+00> : vector<192x8xf32>
    %37 = tpu.matmul %35, %36, %cst_22 {dimension_numbers = #tpu.dot_dimension_numbers<[1], [0], [0], [1], [0, 0, 1, 1], [], []>} : vector<192x24xf32>, vector<24x8xf32>, vector<192x8xf32> -> vector<192x8xf32>
    %38 = arith.addf %19, %37 : vector<192x8xf32>
    %c0_23 = arith.constant 0 : index
    %c0_24 = arith.constant 0 : index
    %39 = vector.load %arg8[%c0_23, %c0_24] : memref<1x8xf32, #tpu.memory_space<vmem>>, vector<1x8xf32>
    %40 = vector.broadcast %39 : vector<1x8xf32> to vector<192x8xf32>
    %41 = arith.addf %38, %40 : vector<192x8xf32>
    %cst_25 = arith.constant 0.000000e+00 : f32
    %42 = vector.broadcast %cst_25 : f32 to vector<192x8xf32>
    %43 = arith.maximumf %41, %42 : vector<192x8xf32>
    %44 = vector.shape_cast %43 : vector<192x8xf32> to vector<2x6x16x8xf32>
    %45 = vector.extract_strided_slice %44 {offsets = [0, 0, 0, 0], sizes = [2, 4, 16, 8], strides = [1, 1, 1, 1]} : vector<2x6x16x8xf32> to vector<2x4x16x8xf32>
    %46 = vector.shape_cast %45 : vector<2x4x16x8xf32> to vector<128x8xf32>
    %47 = vector.extract_strided_slice %44 {offsets = [0, 1, 0, 0], sizes = [2, 4, 16, 8], strides = [1, 1, 1, 1]} : vector<2x6x16x8xf32> to vector<2x4x16x8xf32>
    %48 = vector.shape_cast %47 : vector<2x4x16x8xf32> to vector<128x8xf32>
    %49 = vector.extract_strided_slice %44 {offsets = [0, 2, 0, 0], sizes = [2, 4, 16, 8], strides = [1, 1, 1, 1]} : vector<2x6x16x8xf32> to vector<2x4x16x8xf32>
    %50 = vector.shape_cast %49 : vector<2x4x16x8xf32> to vector<128x8xf32>
    %51 = tpu.concatenate %46, %48, %50 in 1 : vector<128x8xf32>, vector<128x8xf32>, vector<128x8xf32> -> vector<128x24xf32>
    %c0_26 = arith.constant 0 : index
    %c0_27 = arith.constant 0 : index
    %52 = vector.load %arg9[%c0_26, %c0_27] : memref<24x32xf32, #tpu.memory_space<vmem>>, vector<24x32xf32>
    %cst_28 = arith.constant dense<0.000000e+00> : vector<128x32xf32>
    %53 = tpu.matmul %51, %52, %cst_28 {dimension_numbers = #tpu.dot_dimension_numbers<[1], [0], [0], [1], [0, 0, 1, 1], [], []>} : vector<128x24xf32>, vector<24x32xf32>, vector<128x32xf32> -> vector<128x32xf32>
    %c0_29 = arith.constant 0 : index
    %c0_30 = arith.constant 0 : index
    %54 = vector.load %arg10[%c0_29, %c0_30] : memref<1x32xf32, #tpu.memory_space<vmem>>, vector<1x32xf32>
    %55 = vector.broadcast %54 : vector<1x32xf32> to vector<128x32xf32>
    %56 = arith.addf %53, %55 : vector<128x32xf32>
    %57 = vector.extract_strided_slice %56 {offsets = [0, 0], sizes = [128, 16], strides = [1, 1]} : vector<128x32xf32> to vector<128x16xf32>
    %58 = vector.extract_strided_slice %56 {offsets = [0, 16], sizes = [128, 16], strides = [1, 1]} : vector<128x32xf32> to vector<128x16xf32>
    %59 = arith.negf %58 : vector<128x16xf32>
    %60 = math.exp %59 : vector<128x16xf32>
    %cst_31 = arith.constant 1.000000e+00 : f32
    %61 = vector.broadcast %cst_31 : f32 to vector<128x16xf32>
    %62 = arith.addf %61, %60 : vector<128x16xf32>
    %63 = arith.divf %61, %62 : vector<128x16xf32>
    %64 = arith.mulf %57, %63 : vector<128x16xf32>
    %65 = vector.shape_cast %64 : vector<128x16xf32> to vector<8x16x16xf32>
    %66 = vector.extract_strided_slice %65 {offsets = [0, 0, 0], sizes = [8, 1, 16], strides = [1, 1, 1]} : vector<8x16x16xf32> to vector<8x1x16xf32>
    %67 = vector.shape_cast %66 : vector<8x1x16xf32> to vector<8x16xf32>
    %68 = vector.extract_strided_slice %65 {offsets = [0, 1, 0], sizes = [8, 1, 16], strides = [1, 1, 1]} : vector<8x16x16xf32> to vector<8x1x16xf32>
    %69 = vector.shape_cast %68 : vector<8x1x16xf32> to vector<8x16xf32>
    %70 = vector.extract_strided_slice %65 {offsets = [0, 2, 0], sizes = [8, 1, 16], strides = [1, 1, 1]} : vector<8x16x16xf32> to vector<8x1x16xf32>
    %71 = vector.shape_cast %70 : vector<8x1x16xf32> to vector<8x16xf32>
    %72 = vector.extract_strided_slice %65 {offsets = [0, 3, 0], sizes = [8, 1, 16], strides = [1, 1, 1]} : vector<8x16x16xf32> to vector<8x1x16xf32>
    %73 = vector.shape_cast %72 : vector<8x1x16xf32> to vector<8x16xf32>
    %74 = vector.extract_strided_slice %65 {offsets = [0, 4, 0], sizes = [8, 1, 16], strides = [1, 1, 1]} : vector<8x16x16xf32> to vector<8x1x16xf32>
    %75 = vector.shape_cast %74 : vector<8x1x16xf32> to vector<8x16xf32>
    %76 = vector.extract_strided_slice %65 {offsets = [0, 5, 0], sizes = [8, 1, 16], strides = [1, 1, 1]} : vector<8x16x16xf32> to vector<8x1x16xf32>
    %77 = vector.shape_cast %76 : vector<8x1x16xf32> to vector<8x16xf32>
    %78 = vector.extract_strided_slice %65 {offsets = [0, 6, 0], sizes = [8, 1, 16], strides = [1, 1, 1]} : vector<8x16x16xf32> to vector<8x1x16xf32>
    %79 = vector.shape_cast %78 : vector<8x1x16xf32> to vector<8x16xf32>
    %80 = vector.extract_strided_slice %65 {offsets = [0, 7, 0], sizes = [8, 1, 16], strides = [1, 1, 1]} : vector<8x16x16xf32> to vector<8x1x16xf32>
    %81 = vector.shape_cast %80 : vector<8x1x16xf32> to vector<8x16xf32>
    %82 = vector.extract_strided_slice %65 {offsets = [0, 8, 0], sizes = [8, 1, 16], strides = [1, 1, 1]} : vector<8x16x16xf32> to vector<8x1x16xf32>
    %83 = vector.shape_cast %82 : vector<8x1x16xf32> to vector<8x16xf32>
    %84 = vector.extract_strided_slice %65 {offsets = [0, 9, 0], sizes = [8, 1, 16], strides = [1, 1, 1]} : vector<8x16x16xf32> to vector<8x1x16xf32>
    %85 = vector.shape_cast %84 : vector<8x1x16xf32> to vector<8x16xf32>
    %86 = vector.extract_strided_slice %65 {offsets = [0, 10, 0], sizes = [8, 1, 16], strides = [1, 1, 1]} : vector<8x16x16xf32> to vector<8x1x16xf32>
    %87 = vector.shape_cast %86 : vector<8x1x16xf32> to vector<8x16xf32>
    %88 = vector.extract_strided_slice %65 {offsets = [0, 11, 0], sizes = [8, 1, 16], strides = [1, 1, 1]} : vector<8x16x16xf32> to vector<8x1x16xf32>
    %89 = vector.shape_cast %88 : vector<8x1x16xf32> to vector<8x16xf32>
    %90 = vector.extract_strided_slice %65 {offsets = [0, 12, 0], sizes = [8, 1, 16], strides = [1, 1, 1]} : vector<8x16x16xf32> to vector<8x1x16xf32>
    %91 = vector.shape_cast %90 : vector<8x1x16xf32> to vector<8x16xf32>
    %92 = vector.extract_strided_slice %65 {offsets = [0, 13, 0], sizes = [8, 1, 16], strides = [1, 1, 1]} : vector<8x16x16xf32> to vector<8x1x16xf32>
    %93 = vector.shape_cast %92 : vector<8x1x16xf32> to vector<8x16xf32>
    %94 = vector.extract_strided_slice %65 {offsets = [0, 14, 0], sizes = [8, 1, 16], strides = [1, 1, 1]} : vector<8x16x16xf32> to vector<8x1x16xf32>
    %95 = vector.shape_cast %94 : vector<8x1x16xf32> to vector<8x16xf32>
    %96 = vector.extract_strided_slice %65 {offsets = [0, 15, 0], sizes = [8, 1, 16], strides = [1, 1, 1]} : vector<8x16x16xf32> to vector<8x1x16xf32>
    %97 = vector.shape_cast %96 : vector<8x1x16xf32> to vector<8x16xf32>
    %98 = tpu.concatenate %67, %69, %71, %73, %75, %77, %79, %81, %83, %85, %87, %89, %91, %93, %95, %97 in 1 : vector<8x16xf32>, vector<8x16xf32>, vector<8x16xf32>, vector<8x16xf32>, vector<8x16xf32>, vector<8x16xf32>, vector<8x16xf32>, vector<8x16xf32>, vector<8x16xf32>, vector<8x16xf32>, vector<8x16xf32>, vector<8x16xf32>, vector<8x16xf32>, vector<8x16xf32>, vector<8x16xf32>, vector<8x16xf32> -> vector<8x256xf32>
    %cst_32 = arith.constant dense<0.000000e+00> : vector<8xf32>
    %99 = vector.multi_reduction <add>, %98, %cst_32 [1] : vector<8x256xf32> to vector<8xf32>
    %100 = vector.shape_cast %99 : vector<8xf32> to vector<8x1xf32>
    %cst_33 = arith.constant 3.906250e-03 : f32
    %101 = vector.broadcast %cst_33 : f32 to vector<8x1xf32>
    %102 = arith.mulf %100, %101 : vector<8x1xf32>
    %103 = vector.broadcast %102 : vector<8x1xf32> to vector<8x256xf32>
    %104 = arith.subf %98, %103 : vector<8x256xf32>
    %105 = arith.mulf %104, %104 : vector<8x256xf32>
    %cst_34 = arith.constant dense<0.000000e+00> : vector<8xf32>
    %106 = vector.multi_reduction <add>, %105, %cst_34 [1] : vector<8x256xf32> to vector<8xf32>
    %107 = vector.shape_cast %106 : vector<8xf32> to vector<8x1xf32>
    %cst_35 = arith.constant 3.906250e-03 : f32
    %108 = vector.broadcast %cst_35 : f32 to vector<8x1xf32>
    %109 = arith.mulf %107, %108 : vector<8x1xf32>
    %cst_36 = arith.constant 9.99999974E-6 : f32
    %110 = vector.broadcast %cst_36 : f32 to vector<8x1xf32>
    %111 = arith.addf %109, %110 : vector<8x1xf32>
    %112 = math.rsqrt %111 : vector<8x1xf32>
    %113 = vector.broadcast %112 : vector<8x1xf32> to vector<8x256xf32>
    %114 = arith.mulf %104, %113 : vector<8x256xf32>
    %c0_37 = arith.constant 0 : index
    %c0_38 = arith.constant 0 : index
    %115 = vector.load %arg11[%c0_37, %c0_38] : memref<1x256xf32, #tpu.memory_space<vmem>>, vector<1x256xf32>
    %116 = vector.broadcast %115 : vector<1x256xf32> to vector<8x256xf32>
    %117 = arith.mulf %114, %116 : vector<8x256xf32>
    %c0_39 = arith.constant 0 : index
    %c0_40 = arith.constant 0 : index
    %118 = vector.load %arg12[%c0_39, %c0_40] : memref<1x256xf32, #tpu.memory_space<vmem>>, vector<1x256xf32>
    %119 = vector.broadcast %118 : vector<1x256xf32> to vector<8x256xf32>
    %120 = arith.addf %117, %119 : vector<8x256xf32>
    %121 = vector.shape_cast %120 : vector<8x256xf32> to vector<2x4x256xf32>
    %c0_41 = arith.constant 0 : index
    %c0_42 = arith.constant 0 : index
    %c0_43 = arith.constant 0 : index
    %122 = vector.load %arg13[%c0_41, %c0_42, %c0_43] : memref<2x4x256xf32, #tpu.memory_space<vmem>>, vector<2x4x256xf32>
    tpu.vector_store %arg13[%c0_41, %c0_42, %c0_43], %121 {strides = array<i32>} : memref<2x4x256xf32, #tpu.memory_space<vmem>>, vector<2x4x256xf32>,
    return
  }
  func.func @transform_0(%arg0: i32) -> (i32, i32, i32, i32) {
    %c0_i32 = arith.constant 0 : i32
    %c0_i32_0 = arith.constant 0 : i32
    %c0_i32_1 = arith.constant 0 : i32
    %c0_i32_2 = arith.constant 0 : i32
    return %arg0, %c0_i32, %c0_i32_0, %c0_i32_1 : i32, i32, i32, i32
  }
  func.func @transform_1(%arg0: i32) -> (i32, i32) {
    %c0_i32 = arith.constant 0 : i32
    %c0_i32_0 = arith.constant 0 : i32
    %c0_i32_1 = arith.constant 0 : i32
    return %c0_i32, %c0_i32_0 : i32, i32
  }
  func.func @transform_2(%arg0: i32) -> (i32, i32) {
    %c0_i32 = arith.constant 0 : i32
    %c0_i32_0 = arith.constant 0 : i32
    %c0_i32_1 = arith.constant 0 : i32
    return %c0_i32, %c0_i32_0 : i32, i32
  }
  func.func @transform_3(%arg0: i32) -> (i32, i32) {
    %c0_i32 = arith.constant 0 : i32
    %c0_i32_0 = arith.constant 0 : i32
    %c0_i32_1 = arith.constant 0 : i32
    return %c0_i32, %c0_i32_0 : i32, i32
  }
  func.func @transform_4(%arg0: i32) -> (i32, i32) {
    %c0_i32 = arith.constant 0 : i32
    %c0_i32_0 = arith.constant 0 : i32
    %c0_i32_1 = arith.constant 0 : i32
    return %c0_i32, %c0_i32_0 : i32, i32
  }
  func.func @transform_5(%arg0: i32) -> (i32, i32) {
    %c0_i32 = arith.constant 0 : i32
    %c0_i32_0 = arith.constant 0 : i32
    %c0_i32_1 = arith.constant 0 : i32
    return %c0_i32, %c0_i32_0 : i32, i32
  }
  func.func @transform_6(%arg0: i32) -> (i32, i32) {
    %c0_i32 = arith.constant 0 : i32
    %c0_i32_0 = arith.constant 0 : i32
    %c0_i32_1 = arith.constant 0 : i32
    return %c0_i32, %c0_i32_0 : i32, i32
  }
  func.func @transform_7(%arg0: i32) -> (i32, i32) {
    %c0_i32 = arith.constant 0 : i32
    %c0_i32_0 = arith.constant 0 : i32
    %c0_i32_1 = arith.constant 0 : i32
    return %c0_i32, %c0_i32_0 : i32, i32
  }
  func.func @transform_8(%arg0: i32) -> (i32, i32) {
    %c0_i32 = arith.constant 0 : i32
    %c0_i32_0 = arith.constant 0 : i32
    %c0_i32_1 = arith.constant 0 : i32
    return %c0_i32, %c0_i32_0 : i32, i32
  }
  func.func @transform_9(%arg0: i32) -> (i32, i32) {
    %c0_i32 = arith.constant 0 : i32
    %c0_i32_0 = arith.constant 0 : i32
    %c0_i32_1 = arith.constant 0 : i32
    return %c0_i32, %c0_i32_0 : i32, i32
  }
  func.func @transform_10(%arg0: i32) -> (i32, i32) {
    %c0_i32 = arith.constant 0 : i32
    %c0_i32_0 = arith.constant 0 : i32
    %c0_i32_1 = arith.constant 0 : i32
    return %c0_i32, %c0_i32_0 : i32, i32
  }
  func.func @transform_11(%arg0: i32) -> (i32, i32) {
    %c0_i32 = arith.constant 0 : i32
    %c0_i32_0 = arith.constant 0 : i32
    %c0_i32_1 = arith.constant 0 : i32
    return %c0_i32, %c0_i32_0 : i32, i32
  }
  func.func @transform_12(%arg0: i32) -> (i32, i32, i32) {
    %c0_i32 = arith.constant 0 : i32
    %c0_i32_0 = arith.constant 0 : i32
    %c0_i32_1 = arith.constant 0 : i32
    return %arg0, %c0_i32, %c0_i32_0 : i32, i32, i32
  }
}

</mosaic_0001>

<bundles_post_ra>
// kernel: _st_conv_block.1
= control target key start
LH: loop header
LB: loop body
LE: loop exit
PB: predicated region body
PF: predicated region fallthrough
CT: control target
= control target key end

     0   :  { %vm147_vm0 = vcmask 1043456   ;;  %vm74_vm1 = vcmask 97280   ;;  %vm3897_vm2 = vmmov 1   ;;  %vm609_vm4 = vcmask 130048   ;;  %s3900_s18 = smov 16   ;;  %s3902_s20 = smov 48   ;;  %s5161_s2 = inlined_call_operand.vmem [shape: f32[12,32], index: 2, kind: input, shape index: {}]   ;;  %s5162_s0 = inlined_call_operand.vmem [shape: f32[2,6,16,12], index: 0, kind: input, shape index: {}]   ;;  %s5163_s4 = inlined_call_operand.vmem [shape: f32[16,8], index: 4, kind: input, shape index: {}]   ;;  %s5164_s3 = inlined_call_operand.vmem [shape: f32[1,32], index: 3, kind: input, shape index: {}]   ;;  %s5165_s1 = inlined_call_operand.vmem [shape: f32[16,16], index: 1, kind: input, shape index: {}]   ;;  %s5166_s5 = inlined_call_operand.vmem [shape: f32[1,8], index: 5, kind: input, shape index: {}]   ;;  %s5167_s6 = inlined_call_operand.vmem [shape: f32[24,8], index: 6, kind: input, shape index: {}]   ;;  %s5168_s7 = inlined_call_operand.vmem [shape: f32[1,8], index: 7, kind: input, shape index: {}]   ;;  %s5169_s8 = inlined_call_operand.vmem [shape: f32[24,32], index: 8, kind: input, shape index: {}]   ;;  %s5170_s9 = inlined_call_operand.vmem [shape: f32[1,32], index: 9, kind: input, shape index: {}]   ;;  %s5171_s10 = inlined_call_operand.vmem [shape: f32[1,256], index: 10, kind: input, shape index: {}]   ;;  %s5172_s11 = inlined_call_operand.vmem [shape: f32[1,256], index: 11, kind: input, shape index: {}]   ;;  %s5173_s12 = inlined_call_operand.vmem [shape: f32[2,4,256], index: 12, kind: output, shape index: {}]  }
   0x1   :  { %v65_v0 = vld [vmem:[%s5161_s2] sm:$0xff]  ;;  %v66_v1 = vld [vmem:[%s5161_s2 + $0x8] sm:$0xf]  ;;  %vm3698_vm3 = vmpackc.low %vm147_vm0, %vm3897_vm2  ;;  %vm1986_vm5 = vcmask 195584   ;;  %vm2439_vm6 = vcmask 64512   ;;  %vm2860_vm7 = vcmask 1041409  }
   0x2   :  { %v3697_v2 = vpack.c.bf16 %v66_v1, %v65_v0  ;;  %v41_v3 = vld [vmem:[%s5162_s0] sm:$0xff]  ;;  %v42_v4 = vld [vmem:[%s5162_s0 + $0x8] sm:$0xff]  ;;  %v43_v5 = vld [vmem:[%s5162_s0 + $0x10] sm:$0xff]  ;;  %vm2863_vm8 = vcmask 1042434   ;;  %vm2866_vm9 = vcmask 1043459   ;;  %vm2869_vm10 = vcmask 1044484  }
   0x3   :  { %3505 = vmatprep.mubr.msk.f32.mxu0 %vm74_vm1, %v41_v3  ;;  %v61_v6 = vld [vmem:[%s5162_s0 + $0xa0] sm:$0xff]  ;;  %v44_v7 = vld [vmem:[%s5162_s0 + $0x18] sm:$0xff]  ;;  %v62_v8 = vld [vmem:[%s5162_s0 + $0xa8] sm:$0xff]  ;;  %vm2872_vm11 = vcmask 1045509   ;;  %vm2875_vm12 = vcmask 1046534   ;;  %vm2878_vm13 = vcmask 1047559  }
   0x4   :  { %3699 = vmatprep.subr.msk.bf16.mxu0 %vm3698_vm3, %v3697_v2  ;;  %3723 = vmatprep.subr.msk.bf16.mxu1 %vm3698_vm3, %v3697_v2  ;;  %v63_v9 = vld [vmem:[%s5162_s0 + $0xb0] sm:$0xff]  ;;  %v45_v10 = vld [vmem:[%s5162_s0 + $0x20] sm:$0xff]  ;;  %v64_v11 = vld [vmem:[%s5162_s0 + $0xb8] sm:$0xff]  ;;  %s3903_s21 = smov 64   ;;  %vm3143_vm14 = vcmask 261120   ;;  %vm3145_vm15 = vcmask 392192  }
   0x5   :  { %3702 = vmatpush3.bf16.msk.msra.mxu0 %vm3698_vm3, %v3697_v2  ;;  %3724 = vmatpush3.bf16.msk.msra.mxu1 %vm3698_vm3, %v3697_v2  ;;  %v46_v12 = vld [vmem:[%s5162_s0 + $0x28] sm:$0xff]  ;;  %v47_v13 = vld [vmem:[%s5162_s0 + $0x30] sm:$0xff]  ;;  %v48_v14 = vld [vmem:[%s5162_s0 + $0x38] sm:$0xff]  ;;  %vm3147_vm0 = vcmask 523264   ;;  %vm3151_vm2 = vcmask 785408   ;;  %vm3153_vm3 = vcmask 916480  }
   0x6   :  { %3535 = vmatprep.mubr.msk.f32.mxu1 %vm74_vm1, %v61_v6  ;;  %v49_v15 = vld [vmem:[%s5162_s0 + $0x40] sm:$0xff]  ;;  %v50_v16 = vld [vmem:[%s5162_s0 + $0x48] sm:$0xff]  ;;  %v51_v17 = vld [vmem:[%s5162_s0 + $0x50] sm:$0xff] }
   0x7   :  { %v52_v18 = vld [vmem:[%s5162_s0 + $0x58] sm:$0xff]  ;;  %v53_v19 = vld [vmem:[%s5162_s0 + $0x60] sm:$0xff]  ;;  %v54_v20 = vld [vmem:[%s5162_s0 + $0x68] sm:$0xff] }
   0x8   :  { %3506 = vmatmul.mubr.msk.f32.vlgmr.msra.gmra.mrb[0].mxu0 %vm74_vm1, %v42_v4  ;;  %3536 = vmatmul.mubr.msk.f32.vlgmr.msra.gmra.mrb[0].mxu1 %vm74_vm1, %v62_v8  ;;  %v55_v21 = vld [vmem:[%s5162_s0 + $0x70] sm:$0xff]  ;;  %v56_v22 = vld [vmem:[%s5162_s0 + $0x78] sm:$0xff]  ;;  %v57_v23 = vld [vmem:[%s5162_s0 + $0x80] sm:$0xff] }
   0x9   :  { %3508 = vmatprep.mubr.msk.f32.mxu0 %vm74_vm1, %v43_v5  ;;  %3538 = vmatprep.mubr.msk.f32.mxu1 %vm74_vm1, %v63_v9  ;;  %v58_v24 = vld [vmem:[%s5162_s0 + $0x88] sm:$0xff]  ;;  %v59_v25 = vld [vmem:[%s5162_s0 + $0x90] sm:$0xff]  ;;  %v60_v26 = vld [vmem:[%s5162_s0 + $0x98] sm:$0xff]  ;;  %s3898_s0 = smov 112  }
   0xa   :  { %v600_v27 = vld [vmem:[%s5163_s4] sm:$0xff]  ;;  %v601_v28 = vld [vmem:[%s5163_s4 + $0x8] sm:$0xff]  ;;  %s3905_s4 = smov 96  }
   0xb   :  { %v3703_v29 = vpack.c.bf16 %v601_v28, %v600_v27  ;;  %v4082_v30 = vld [vmem:[%s5164_s3] ss:$0 sm:$0xff]  ;;  %s3904_s3 = smov 80  }
   0xc   :  { %3509 = vmatmul.mubr.msk.f32.gmra.mrb[2].mxu0 %vm74_vm1, %v44_v7  ;;  %3539 = vmatmul.mubr.msk.f32.gmra.mrb[2].mxu1 %vm74_vm1, %v64_v11 }
   0xd   :  { %3511 = vmatprep.mubr.msk.f32.mxu0 %vm74_vm1, %v45_v10  ;;  %3704 = vmatprep.subr.bf16.mxu1 %v3703_v29 }
   0xe   :  { %3706 = vmatpush3.bf16.msra.mxu1 %v3703_v29 }
  0x10   :  { %3512 = vmatmul.mubr.msk.f32.gmra.mrb[4].mxu0 %vm74_vm1, %v46_v12 }
  0x11   :  { %3514 = vmatprep.mubr.msk.f32.mxu0 %vm74_vm1, %v47_v13 }
  0x14   :  { %3515 = vmatmul.mubr.msk.f32.gmra.mrb[6].mxu0 %vm74_vm1, %v48_v14 }
  0x15   :  { %3517 = vmatprep.mubr.msk.f32.mxu0 %vm74_vm1, %v49_v15 }
  0x18   :  { %3518 = vmatmul.mubr.msk.f32.gmra.mrb[8].mxu0 %vm74_vm1, %v50_v16 }
  0x19   :  { %3520 = vmatprep.mubr.msk.f32.mxu0 %vm74_vm1, %v51_v17 }
  0x1c   :  { %3521 = vmatmul.mubr.msk.f32.gmra.mrb[10].mxu0 %vm74_vm1, %v52_v18 }
  0x1d   :  { %3523 = vmatprep.mubr.msk.f32.mxu0 %vm74_vm1, %v53_v19 }
  0x20   :  { %3524 = vmatmul.mubr.msk.f32.gmra.mrb[12].mxu0 %vm74_vm1, %v54_v20 }
  0x21   :  { %3526 = vmatprep.mubr.msk.f32.mxu0 %vm74_vm1, %v55_v21 }
  0x24   :  { %3527 = vmatmul.mubr.msk.f32.gmra.mrb[14].mxu0 %vm74_vm1, %v56_v22 }
  0x25   :  { %3529 = vmatprep.mubr.msk.f32.mxu0 %vm74_vm1, %v57_v23 }
  0x28   :  { %3530 = vmatmul.mubr.msk.f32.gmra.mrb[16].mxu0 %vm74_vm1, %v58_v24 }
  0x29   :  { %3532 = vmatprep.mubr.msk.f32.mxu0 %vm74_vm1, %v59_v25 }
  0x2c   :  { %3533 = vmatmul.mubr.msk.f32.gmra.mrb[18].mxu0 %vm74_vm1, %v60_v26  ;;  %vm3149_vm1 = vcmask 654336  }
  0xdb   :  { %v3507_v31 = vpop.f32.mrb[0].mxu0  ;;  %v3537_v35 = vpop.f32.mrb[0].mxu1 }
  0xdc   :  { %v4085_v32 = vadd.f32 %v3507_v31, %v4082_v30  ;;  %v217_v33 = vpop.f32.mrb[1].mxu0  ;;  %v317_v37 = vpop.f32.mrb[1].mxu1  ;;  %v4105_v48 = vadd.f32 %v3537_v35, %v4082_v30 }
  0xdd   :  { %v4088_v34 = vadd.f32 %v4082_v30, %v217_v33  ;;  %v4114_v52 = vadd.f32 %v4082_v30, %v317_v37 }
  0xde   :  { %v3245_v36 = vmul.f32 -1.442695, %v4085_v32  ;;  %v3265_v56 = vmul.f32 -1.442695, %v4105_v48 }
  0xdf   :  { %v3244_v38 = vmul.f32 -1.442695, %v4088_v34  ;;  %v3510_v39 = vpop.f32.mrb[2].mxu0  ;;  %v4098_v43 = vpop.f32.mrb[2].mxu1  ;;  %v3264_v60 = vmul.f32 -1.442695, %v4114_v52 }
  0xe0   :  { %3735 = vpow2.f32 %v3245_v36  ;;  %v4093_v40 = vadd.f32 %v3510_v39, %v4082_v30  ;;  %v227_v41 = vpop.f32.mrb[3].mxu0  ;;  %v4101_v45 = vpop.f32.mrb[3].mxu1 }
  0xe1   :  { %3737 = vpow2.f32 %v3244_v38  ;;  %v4096_v42 = vadd.f32 %v4082_v30, %v227_v41 }
  0xe2   :  { %v3247_v44 = vmul.f32 -1.442695, %v4093_v40 }
  0xe3   :  { %v3246_v46 = vmul.f32 -1.442695, %v4096_v42  ;;  %v3513_v47 = vpop.f32.mrb[4].mxu0 }
  0xe4   :  { %3739 = vpow2.f32 %v3247_v44  ;;  %v4108_v49 = vadd.f32 %v3513_v47, %v4082_v30  ;;  %v237_v50 = vpop.f32.mrb[5].mxu0 }
  0xe5   :  { %3741 = vpow2.f32 %v3246_v46  ;;  %v4111_v51 = vadd.f32 %v4082_v30, %v237_v50 }
  0xe6   :  { %v3249_v53 = vmul.f32 -1.442695, %v4108_v49 }
  0xe7   :  { %v3248_v54 = vmul.f32 -1.442695, %v4111_v51  ;;  %v3516_v55 = vpop.f32.mrb[6].mxu0 }
  0xe8   :  { %3743 = vpow2.f32 %v3249_v53  ;;  %v4120_v57 = vadd.f32 %v3516_v55, %v4082_v30  ;;  %v247_v58 = vpop.f32.mrb[7].mxu0 }
  0xe9   :  { %3745 = vpow2.f32 %v3248_v54  ;;  %v4123_v59 = vadd.f32 %v4082_v30, %v247_v58 }
  0xea   :  { %v3736_v61 = vpop.eup %3735  ;;  %v3251_v62 = vmul.f32 -1.442695, %v4120_v57  ;;  %3747 = vpow2.f32 %v3265_v56 }
  0xeb   :  { %v3738_v63 = vpop.eup %3737  ;;  %v3250_v0 = vmul.f32 -1.442695, %v4123_v59  ;;  %v3519_v1 = vpop.f32.mrb[8].mxu0  ;;  %v409_v5 = vadd.f32 1.0, %v3736_v61 }
  0xec   :  { %v408_v2 = vadd.f32 1.0, %v3738_v63  ;;  %3749 = vpow2.f32 %v3251_v62  ;;  %v4129_v3 = vadd.f32 %v3519_v1, %v4082_v30  ;;  %v257_v4 = vpop.f32.mrb[9].mxu0 }
  0xed   :  { %v4132_v6 = vadd.f32 %v4082_v30, %v257_v4  ;;  %3751 = vpow2.f32 %v3264_v60 }
  0xee   :  { %v3740_v7 = vpop.eup %3739  ;;  %3753 = vrcp.f32 %v408_v2  ;;  %v3253_v8 = vmul.f32 -1.442695, %v4129_v3 }
  0xef   :  { %v3742_v9 = vpop.eup %3741  ;;  %3755 = vpow2.f32 %v3250_v0  ;;  %v3252_v10 = vmul.f32 -1.442695, %v4132_v6  ;;  %v3522_v11 = vpop.f32.mrb[10].mxu0  ;;  %v411_v15 = vadd.f32 1.0, %v3740_v7 }
  0xf0   :  { %v410_v12 = vadd.f32 1.0, %v3742_v9  ;;  %3757 = vpow2.f32 %v3253_v8  ;;  %v4137_v13 = vadd.f32 %v3522_v11, %v4082_v30  ;;  %v267_v14 = vpop.f32.mrb[11].mxu0 }
  0xf1   :  { %3759 = vrcp.f32 %v409_v5  ;;  %v4140_v16 = vadd.f32 %v4082_v30, %v267_v14 }
  0xf2   :  { %v3744_v17 = vpop.eup %3743  ;;  %3761 = vrcp.f32 %v410_v12  ;;  %v3255_v18 = vmul.f32 -1.442695, %v4137_v13 }
  0xf3   :  { %v3746_v19 = vpop.eup %3745  ;;  %3763 = vpow2.f32 %v3252_v10  ;;  %v3254_v20 = vmul.f32 -1.442695, %v4140_v16  ;;  %v3525_v21 = vpop.f32.mrb[12].mxu0  ;;  %v413_v26 = vadd.f32 1.0, %v3744_v17 }
  0xf4   :  { %v412_v22 = vadd.f32 1.0, %v3746_v19  ;;  %3765 = vpow2.f32 %v3255_v18  ;;  %v4145_v23 = vadd.f32 %v3525_v21, %v4082_v30  ;;  %v277_v24 = vpop.f32.mrb[13].mxu0  ;;  %v4147_v25 = vpop.eup %3747 }
  0xf5   :  { %3767 = vrcp.f32 %v411_v15  ;;  %v4150_v27 = vadd.f32 %v4082_v30, %v277_v24  ;;  %v4185_v15 = vadd.f32 %v4098_v43, %v4082_v30 }
  0xf6   :  { %v3750_v28 = vpop.eup %3749  ;;  %3769 = vrcp.f32 %v412_v22  ;;  %v3257_v29 = vmul.f32 -1.442695, %v4145_v23 }
  0xf7   :  { %v4153_v31 = vpop.eup %3751  ;;  %v415_v33 = vadd.f32 1.0, %v3750_v28  ;;  %3771 = vpow2.f32 %v3254_v20  ;;  %v3256_v35 = vmul.f32 -1.442695, %v4150_v27  ;;  %v3528_v36 = vpop.f32.mrb[14].mxu0  ;;  %v4190_v20 = vadd.f32 %v4082_v30, %v4101_v45 }
  0xf8   :  { %v3754_v37 = vpop.eup %3753  ;;  %3773 = vpow2.f32 %v3257_v29  ;;  %v4157_v38 = vadd.f32 %v3528_v36, %v4082_v30  ;;  %v287_v39 = vpop.f32.mrb[15].mxu0  ;;  %v3267_v29 = vmul.f32 -1.442695, %v4185_v15 }
  0xf9   :  { %v3756_v41 = vpop.eup %3755  ;;  %3775 = vrcp.f32 %v413_v26  ;;  %v4160_v44 = vadd.f32 %v4082_v30, %v287_v39  ;;  %504 = vrot.lane.b32.xlu0 %v3754_v37, %s3898_s0 }
  0xfa   :  { %v3758_v46 = vpop.eup %3757  ;;  %v414_v47 = vadd.f32 1.0, %v3756_v41  ;;  %3777 = vpow2.f32 %v3256_v35  ;;  %v3259_v50 = vmul.f32 -1.442695, %v4157_v38  ;;  %v3266_v35 = vmul.f32 -1.442695, %v4190_v20 }
  0xfb   :  { %v3760_v53 = vpop.eup %3759  ;;  %3779 = vrcp.f32 %v415_v33  ;;  %v417_v54 = vadd.f32 1.0, %v3758_v46  ;;  %v3258_v55 = vmul.f32 -1.442695, %v4160_v44  ;;  %v3531_v56 = vpop.f32.mrb[16].mxu0 }
  0xfc   :  { %v3762_v58 = vpop.eup %3761  ;;  %3781 = vrcp.f32 %v414_v47  ;;  %v4166_v60 = vadd.f32 %v3531_v56, %v4082_v30  ;;  %v297_v61 = vpop.f32.mrb[17].mxu0 }
  0xfd   :  { %v3764_v62 = vpop.eup %3763  ;;  %3783 = vrcp.f32 %v417_v54  ;;  %v4169_v63 = vadd.f32 %v4082_v30, %v297_v61  ;;  %508 = vrot.lane.b32.xlu1 %v3762_v58, %s3898_s0  ;;  %506 = vrot.lane.b32.xlu0 %v3760_v53, %s3898_s0 }
  0xfe   :  { %v3766_v0 = vpop.eup %3765  ;;  %v416_v1 = vadd.f32 1.0, %v3764_v62  ;;  %3785 = vpow2.f32 %v3259_v50  ;;  %v3261_v2 = vmul.f32 -1.442695, %v4166_v60 }
  0xff   :  { %v3768_v4 = vpop.eup %3767  ;;  %v419_v5 = vadd.f32 1.0, %v3766_v0  ;;  %3787 = vpow2.f32 %v3258_v55  ;;  %v3260_v7 = vmul.f32 -1.442695, %v4169_v63  ;;  %v3534_v8 = vpop.f32.mrb[18].mxu0 }
 0x100   :  { %v3770_v9 = vpop.eup %3769  ;;  %3789 = vrcp.f32 %v416_v1  ;;  %v4176_v10 = vadd.f32 %v3534_v8, %v4082_v30  ;;  %v307_v11 = vpop.f32.mrb[19].mxu0 }
 0x101   :  { %v3772_v12 = vpop.eup %3771  ;;  %3791 = vrcp.f32 %v419_v5  ;;  %v4179_v14 = vadd.f32 %v4082_v30, %v307_v11  ;;  %510 = vrot.lane.b32.xlu1 %v3768_v4, %s3898_s0  ;;  %512 = vrot.lane.b32.xlu0 %v3770_v9, %s3898_s0  ;;  %v428_v4 = vadd.f32 1.0, %v4153_v31 }
 0x102   :  { %v3774_v17 = vpop.eup %3773  ;;  %v418_v18 = vadd.f32 1.0, %v3772_v12  ;;  %3793 = vpow2.f32 %v3261_v2  ;;  %v3263_v19 = vmul.f32 -1.442695, %v4176_v10 }
 0x103   :  { %v3776_v21 = vpop.eup %3775  ;;  %v421_v22 = vadd.f32 1.0, %v3774_v17  ;;  %3795 = vpow2.f32 %v3260_v7  ;;  %v3262_v26 = vmul.f32 -1.442695, %v4179_v14  ;;  %v429_v7 = vadd.f32 1.0, %v4147_v25 }
 0x104   :  { %v3778_v24 = vpop.eup %3777  ;;  %3797 = vrcp.f32 %v418_v18 }
 0x105   :  { %v3780_v28 = vpop.eup %3779  ;;  %3799 = vrcp.f32 %v421_v22  ;;  %v420_v43 = vadd.f32 1.0, %v3778_v24  ;;  %514 = vrot.lane.b32.xlu1 %v3776_v21, %s3898_s0 }
 0x106   :  { %v3782_v33 = vpop.eup %3781  ;;  %3801 = vpow2.f32 %v3263_v19 }
 0x107   :  { %v3784_v30 = vpop.eup %3783  ;;  %3803 = vrcp.f32 %v420_v43  ;;  %516 = vrot.lane.b32.xlu0 %v3782_v33, %s3898_s0 }
 0x108   :  { %v3786_v45 = vpop.eup %3785  ;;  %3805 = vpow2.f32 %v3262_v26 }
 0x109   :  { %v3788_v36 = vpop.eup %3787  ;;  %v423_v37 = vadd.f32 1.0, %v3786_v45  ;;  %3807 = vpow2.f32 %v3267_v29  ;;  %518 = vrot.lane.b32.xlu1 %v3780_v28, %s3898_s0 }
 0x10a   :  { %v3790_v39 = vpop.eup %3789  ;;  %v422_v41 = vadd.f32 1.0, %v3788_v36  ;;  %3809 = vpow2.f32 %v3266_v35 }
 0x10b   :  { %v3792_v46 = vpop.eup %3791  ;;  %3811 = vrcp.f32 %v423_v37  ;;  %520 = vrot.lane.b32.xlu0 %v3790_v39, %s3898_s0 }
 0x10c   :  { %v3794_v47 = vpop.eup %3793  ;;  %3813 = vrcp.f32 %v422_v41 }
 0x10d   :  { %v3796_v50 = vpop.eup %3795  ;;  %v425_v53 = vadd.f32 1.0, %v3794_v47  ;;  %522 = vrot.lane.b32.xlu1 %v3784_v30, %s3898_s0 }
 0x10e   :  { %v3798_v54 = vpop.eup %3797  ;;  %v424_v55 = vadd.f32 1.0, %v3796_v50 }
 0x10f   :  { %v3800_v56 = vpop.eup %3799  ;;  %3815 = vrcp.f32 %v425_v53  ;;  %524 = vrot.lane.b32.xlu0 %v3798_v54, %s3898_s0 }
 0x110   :  { %v3802_v58 = vpop.eup %3801  ;;  %3817 = vrcp.f32 %v424_v55 }
 0x111   :  { %v3804_v61 = vpop.eup %3803  ;;  %v427_v62 = vadd.f32 1.0, %v3802_v58  ;;  %526 = vrot.lane.b32.xlu1 %v3792_v46, %s3898_s0 }
 0x112   :  { %v3806_v0 = vpop.eup %3805 }
 0x113   :  { %v3808_v1 = vpop.eup %3807  ;;  %v426_v2 = vadd.f32 1.0, %v3806_v0  ;;  %528 = vrot.lane.b32.xlu0 %v3804_v61, %s3898_s0  ;;  %3819 = vrcp.f32 %v427_v62 }
 0x114   :  { %v3810_v5 = vpop.eup %3809  ;;  %v431_v12 = vadd.f32 1.0, %v3808_v1 }
 0x115   :  { %v3812_v8 = vpop.eup %3811  ;;  %3821 = vrcp.f32 %v426_v2  ;;  %530 = vrot.lane.b32.xlu1 %v3800_v56, %s3898_s0  ;;  %v430_v11 = vadd.f32 1.0, %v3810_v5 }
 0x116   :  { %v3814_v9 = vpop.eup %3813  ;;  %3823 = vrcp.f32 %v428_v4 }
 0x117   :  { %532 = vrot.lane.b32.xlu0 %v3814_v9, %s3898_s0  ;;  %3825 = vrcp.f32 %v429_v7 }
 0x118   :  { %3827 = vrcp.f32 %v430_v11 }
 0x119   :  { %v3816_v17 = vpop.eup %3815  ;;  %534 = vrot.lane.b32.xlu1 %v3812_v8, %s3898_s0  ;;  %3829 = vrcp.f32 %v431_v12 }
 0x11a   :  { %v3818_v31 = vpop.eup %3817 }
 0x11b   :  { %536 = vrot.lane.b32.xlu0 %v3818_v31, %s3898_s0 }
 0x11d   :  { %538 = vrot.lane.b32.xlu1 %v3816_v17, %s3898_s0  ;;  %v3820_v25 = vpop.eup %3819 }
 0x11f   :  { %v3822_v18 = vpop.eup %3821 }
 0x120   :  { %540 = vrot.lane.b32.xlu0 %v3822_v18, %s3898_s0  ;;  %v3824_v19 = vpop.eup %3823 }
 0x121   :  { %542 = vrot.lane.b32.xlu1 %v3820_v25, %s3898_s0  ;;  %v3826_v21 = vpop.eup %3825 }
 0x122   :  { %v3828_v22 = vpop.eup %3827 }
 0x123   :  { %v3830_v24 = vpop.eup %3829 }
 0x124   :  { %544 = vrot.lane.b32.xlu0 %v3824_v19, %s3898_s0 }
 0x125   :  { %546 = vrot.lane.b32.xlu1 %v3826_v21, %s3898_s0 }
 0x128   :  { %548 = vrot.lane.b32.xlu0 %v3828_v22, %s3898_s0 }
 0x129   :  { %550 = vrot.lane.b32.xlu1 %v3830_v24, %s3898_s0 }
 0x16b   :  { %v505_v26 = vpop.permute.xlu0 %504 }
 0x16c   :  { %v576_v28 = vmul.f32 %v505_v26, %v4088_v34 }
 0x16e   :  { %3545 = vmatprep.mubr.msk.f32.mxu1 %vm609_vm4, %v576_v28 }
 0x16f   :  { %v509_v43 = vpop.permute.xlu1 %508  ;;  %v507_v29 = vpop.permute.xlu0 %506 }
 0x170   :  { %v578_v33 = vmul.f32 %v509_v43, %v4096_v42  ;;  %v577_v35 = vmul.f32 %v507_v29, %v4085_v32 }
 0x172   :  { %3546 = vmatmul.mubr.msk.f32.vlgmr.msra.gmra.mrb[4].mxu1 %vm609_vm4, %v577_v35 }
 0x173   :  { %v511_v30 = vpop.permute.xlu1 %510  ;;  %3548 = vmatprep.mubr.msk.f32.mxu1 %vm609_vm4, %v578_v33  ;;  %v513_v45 = vpop.permute.xlu0 %512 }
 0x174   :  { %v579_v36 = vmul.f32 %v511_v30, %v4093_v40  ;;  %v580_v37 = vmul.f32 %v513_v45, %v4111_v51 }
 0x176   :  { %3549 = vmatmul.mubr.msk.f32.gmra.mrb[6].mxu1 %vm609_vm4, %v579_v36 }
 0x177   :  { %v515_v34 = vpop.permute.xlu1 %514  ;;  %3551 = vmatprep.mubr.msk.f32.mxu1 %vm609_vm4, %v580_v37 }
 0x178   :  { %v581_v39 = vmul.f32 %v515_v34, %v4108_v49 }
 0x179   :  { %v517_v42 = vpop.permute.xlu0 %516 }
 0x17a   :  { %v582_v32 = vmul.f32 %v517_v42, %v4123_v59  ;;  %3552 = vmatmul.mubr.msk.f32.gmra.mrb[8].mxu1 %vm609_vm4, %v581_v39 }
 0x17b   :  { %v519_v41 = vpop.permute.xlu1 %518 }
 0x17c   :  { %v583_v46 = vmul.f32 %v519_v41, %v4120_v57  ;;  %3554 = vmatprep.mubr.msk.f32.mxu1 %vm609_vm4, %v582_v32 }
 0x17d   :  { %v521_v40 = vpop.permute.xlu0 %520 }
 0x17e   :  { %v584_v51 = vmul.f32 %v521_v40, %v4132_v6  ;;  %3555 = vmatmul.mubr.msk.f32.gmra.mrb[10].mxu1 %vm609_vm4, %v583_v46 }
 0x17f   :  { %v523_v47 = vpop.permute.xlu1 %522 }
 0x180   :  { %v585_v50 = vmul.f32 %v523_v47, %v4129_v3  ;;  %3557 = vmatprep.mubr.msk.f32.mxu1 %vm609_vm4, %v584_v51 }
 0x181   :  { %v525_v49 = vpop.permute.xlu0 %524 }
 0x182   :  { %v586_v59 = vmul.f32 %v525_v49, %v4140_v16  ;;  %3558 = vmatmul.mubr.msk.f32.gmra.mrb[12].mxu1 %vm609_vm4, %v585_v50 }
 0x183   :  { %v527_v53 = vpop.permute.xlu1 %526 }
 0x184   :  { %v587_v57 = vmul.f32 %v527_v53, %v4137_v13  ;;  %3560 = vmatprep.mubr.msk.f32.mxu1 %vm609_vm4, %v586_v59 }
 0x185   :  { %v529_v54 = vpop.permute.xlu0 %528 }
 0x186   :  { %v588_v6 = vmul.f32 %v529_v54, %v4150_v27  ;;  %3561 = vmatmul.mubr.msk.f32.gmra.mrb[14].mxu1 %vm609_vm4, %v587_v57 }
 0x187   :  { %v531_v55 = vpop.permute.xlu1 %530 }
 0x188   :  { %v589_v3 = vmul.f32 %v531_v55, %v4145_v23  ;;  %3563 = vmatprep.mubr.msk.f32.mxu1 %vm609_vm4, %v588_v6 }
 0x189   :  { %v533_v56 = vpop.permute.xlu0 %532 }
 0x18a   :  { %v590_v16 = vmul.f32 %v533_v56, %v4160_v44  ;;  %3564 = vmatmul.mubr.msk.f32.gmra.mrb[16].mxu1 %vm609_vm4, %v589_v3 }
 0x18b   :  { %v535_v58 = vpop.permute.xlu1 %534 }
 0x18c   :  { %v591_v13 = vmul.f32 %v535_v58, %v4157_v38  ;;  %3566 = vmatprep.mubr.msk.f32.mxu1 %vm609_vm4, %v590_v16 }
 0x18d   :  { %v537_v61 = vpop.permute.xlu0 %536 }
 0x18e   :  { %v592_v27 = vmul.f32 %v537_v61, %v4169_v63  ;;  %3567 = vmatmul.mubr.msk.f32.gmra.mrb[18].mxu1 %vm609_vm4, %v591_v13 }
 0x18f   :  { %v539_v62 = vpop.permute.xlu1 %538 }
 0x190   :  { %v593_v23 = vmul.f32 %v539_v62, %v4166_v60  ;;  %3569 = vmatprep.mubr.msk.f32.mxu1 %vm609_vm4, %v592_v27 }
 0x192   :  { %v541_v0 = vpop.permute.xlu0 %540  ;;  %3570 = vmatmul.mubr.msk.f32.gmra.mrb[20].mxu1 %vm609_vm4, %v593_v23 }
 0x193   :  { %v594_v44 = vmul.f32 %v541_v0, %v4179_v14  ;;  %v543_v1 = vpop.permute.xlu1 %542 }
 0x194   :  { %v595_v38 = vmul.f32 %v543_v1, %v4176_v10 }
 0x195   :  { %3572 = vmatprep.mubr.msk.f32.mxu1 %vm609_vm4, %v594_v44 }
 0x196   :  { %v545_v2 = vpop.permute.xlu0 %544  ;;  %3573 = vmatmul.mubr.msk.f32.gmra.mrb[22].mxu1 %vm609_vm4, %v595_v38 }
 0x197   :  { %v596_v63 = vmul.f32 %v545_v2, %v4114_v52  ;;  %v547_v4 = vpop.permute.xlu1 %546  ;;  %v1251_v52 = vld [vmem:[%s5165_s1] sm:$0xff] }
 0x198   :  { %v597_v60 = vmul.f32 %v547_v4, %v4105_v48  ;;  %v1252_v48 = vld [vmem:[%s5165_s1 + $0x8] sm:$0xff] }
 0x199   :  { %3575 = vmatprep.mubr.msk.f32.mxu1 %vm609_vm4, %v596_v63  ;;  %v3707_v8 = vpack.c.bf16 %v1252_v48, %v1251_v52 }
 0x19a   :  { %v549_v5 = vpop.permute.xlu0 %548  ;;  %3576 = vmatmul.mubr.msk.f32.gmra.mrb[24].mxu1 %vm609_vm4, %v597_v60 }
 0x19b   :  { %v598_v14 = vmul.f32 %v549_v5, %v4190_v20  ;;  %v551_v7 = vpop.permute.xlu1 %550  ;;  %3708 = vmatprep.subr.bf16.mxu0 %v3707_v8  ;;  %3712 = vmatprep.subr.bf16.mxu1 %v3707_v8 }
 0x19c   :  { %v599_v10 = vmul.f32 %v551_v7, %v4185_v15  ;;  %3710 = vmatpush3.bf16.msra.mxu0 %v3707_v8  ;;  %3714 = vmatpush3.bf16.msra.mxu1 %v3707_v8  ;;  %v4273_v15 = vld [vmem:[%s5166_s5] ss:$0 sm:$0xff] }
 0x19d   :  { %3578 = vmatprep.mubr.msk.f32.mxu1 %vm609_vm4, %v598_v14 }
 0x19e   :  { %3579 = vmatmul.mubr.msk.f32.gmra.mrb[26].mxu1 %vm609_vm4, %v599_v10 }
 0x245   :  { %v3547_v20 = vpop.f32.mrb[4].mxu1 }
 0x246   :  { %v748_v9 = vpop.f32.mrb[5].mxu1  ;;  %v4280_v31 = vadd.f32 %v3547_v20, %v4273_v15 }
 0x247   :  { %v4276_v11 = vadd.f32 %v4273_v15, %v748_v9 }
 0x249   :  { %v3550_v12 = vpop.f32.mrb[6].mxu1  ;;  %867 = vxpose.xlu0.b32.start [1/2] (short) (narrow) %v4276_v11, 8 }
 0x24a   :  { %v758_v17 = vpop.f32.mrb[7].mxu1  ;;  %v4288_v21 = vadd.f32 %v3550_v12, %v4273_v15 }
 0x24b   :  { %v4283_v25 = vadd.f32 %v4273_v15, %v758_v17 }
 0x24d   :  { %899 = vxpose.xlu1.b32.start [1/2] (short) (narrow) %v4283_v25, 8  ;;  %868 = vxpose.xlu0.b32.end [2/2] (short) (narrow) %v4280_v31, 8  ;;  %v3553_v18 = vpop.f32.mrb[8].mxu1 }
 0x24e   :  { %v768_v19 = vpop.f32.mrb[9].mxu1  ;;  %v4296_v28 = vadd.f32 %v3553_v18, %v4273_v15 }
 0x24f   :  { %v4291_v22 = vadd.f32 %v4273_v15, %v768_v19 }
 0x251   :  { %900 = vxpose.xlu1.b32.end [2/2] (short) (narrow) %v4288_v21, 8  ;;  %931 = vxpose.xlu0.b32.start [1/2] (short) (narrow) %v4291_v22, 8  ;;  %v3556_v24 = vpop.f32.mrb[10].mxu1 }
 0x252   :  { %v778_v26 = vpop.f32.mrb[11].mxu1  ;;  %v4308_v36 = vadd.f32 %v3556_v24, %v4273_v15 }
 0x253   :  { %v4300_v33 = vadd.f32 %v4273_v15, %v778_v26 }
 0x255   :  { %932 = vxpose.xlu0.b32.end [2/2] (short) (narrow) %v4296_v28, 8  ;;  %v3559_v43 = vpop.f32.mrb[12].mxu1 }
 0x256   :  { %v788_v29 = vpop.f32.mrb[13].mxu1  ;;  %v4311_v37 = vadd.f32 %v3559_v43, %v4273_v15  ;;  %v1983_v43 = vld [vmem:[%s5167_s6] sm:$0xff] }
 0x257   :  { %v4303_v35 = vadd.f32 %v4273_v15, %v788_v29  ;;  %v1984_v29 = vld [vmem:[%s5167_s6 + $0x8] sm:$0xff] }
 0x259   :  { %963 = vxpose.xlu0.b32.start [1/2] (short) (narrow) %v4300_v33, 8  ;;  %995 = vxpose.xlu1.b32.start [1/2] (short) (narrow) %v4303_v35, 8  ;;  %v3562_v30 = vpop.f32.mrb[14].mxu1 }
 0x25a   :  { %v798_v45 = vpop.f32.mrb[15].mxu1  ;;  %v4324_v40 = vadd.f32 %v3562_v30, %v4273_v15  ;;  %v3715_v30 = vpack.c.bf16 %v1984_v29, %v1983_v43 }
 0x25b   :  { %v4316_v42 = vadd.f32 %v4273_v15, %v798_v45  ;;  %v1985_v45 = vld [vmem:[%s5167_s6 + $0x10] sm:$0xff] }
 0x25c   :  { %3716 = vmatprep.subr.bf16.mxu0 %v3715_v30 }
 0x25d   :  { %964 = vxpose.xlu0.b32.end [2/2] (short) (narrow) %v4308_v36, 8  ;;  %996 = vxpose.xlu1.b32.end [2/2] (short) (narrow) %v4311_v37, 8  ;;  %v3565_v34 = vpop.f32.mrb[16].mxu1 }
 0x25e   :  { %v808_v39 = vpop.f32.mrb[17].mxu1  ;;  %v4327_v51 = vadd.f32 %v3565_v34, %v4273_v15 }
 0x25f   :  { %v4319_v32 = vadd.f32 %v4273_v15, %v808_v39 }
 0x261   :  { %1027 = vxpose.xlu0.b32.start [1/2] (short) (narrow) %v4316_v42, 8  ;;  %1059 = vxpose.xlu1.b32.start [1/2] (short) (narrow) %v4319_v32, 8  ;;  %v3568_v41 = vpop.f32.mrb[18].mxu1 }
 0x262   :  { %v818_v46 = vpop.f32.mrb[19].mxu1  ;;  %v4340_v54 = vadd.f32 %v3568_v41, %v4273_v15 }
 0x263   :  { %v4332_v49 = vadd.f32 %v4273_v15, %v818_v46 }
 0x265   :  { %1028 = vxpose.xlu0.b32.end [2/2] (short) (narrow) %v4324_v40, 8  ;;  %1060 = vxpose.xlu1.b32.end [2/2] (short) (narrow) %v4327_v51, 8  ;;  %v3571_v47 = vpop.f32.mrb[20].mxu1 }
 0x266   :  { %v828_v50 = vpop.f32.mrb[21].mxu1  ;;  %v4343_v6 = vadd.f32 %v3571_v47, %v4273_v15 }
 0x267   :  { %v4335_v59 = vadd.f32 %v4273_v15, %v828_v50 }
 0x269   :  { %1091 = vxpose.xlu0.b32.start [1/2] (short) (narrow) %v4332_v49, 8  ;;  %1123 = vxpose.xlu1.b32.start [1/2] (short) (narrow) %v4335_v59, 8  ;;  %v3574_v53 = vpop.f32.mrb[22].mxu1 }
 0x26a   :  { %v838_v57 = vpop.f32.mrb[23].mxu1  ;;  %v4356_v61 = vadd.f32 %v3574_v53, %v4273_v15 }
 0x26b   :  { %v4348_v56 = vadd.f32 %v4273_v15, %v838_v57 }
 0x26d   :  { %1092 = vxpose.xlu0.b32.end [2/2] (short) (narrow) %v4340_v54, 8  ;;  %1124 = vxpose.xlu1.b32.end [2/2] (short) (narrow) %v4343_v6, 8  ;;  %v3577_v55 = vpop.f32.mrb[24].mxu1 }
 0x26e   :  { %v848_v3 = vpop.f32.mrb[25].mxu1  ;;  %v4359_v27 = vadd.f32 %v3577_v55, %v4273_v15 }
 0x26f   :  { %v4351_v16 = vadd.f32 %v4273_v15, %v848_v3 }
 0x271   :  { %1155 = vxpose.xlu0.b32.start [1/2] (short) (narrow) %v4348_v56, 8  ;;  %1187 = vxpose.xlu1.b32.start [1/2] (short) (narrow) %v4351_v16, 8  ;;  %v3580_v58 = vpop.f32.mrb[26].mxu1 }
 0x272   :  { %v858_v13 = vpop.f32.mrb[27].mxu1  ;;  %v4368_v23 = vadd.f32 %v3580_v58, %v4273_v15 }
 0x273   :  { %v4364_v62 = vadd.f32 %v4273_v15, %v858_v13 }
 0x275   :  { %1156 = vxpose.xlu0.b32.end [2/2] (short) (narrow) %v4356_v61, 8  ;;  %1188 = vxpose.xlu1.b32.end [2/2] (short) (narrow) %v4359_v27, 8 }
 0x279   :  { %1219 = vxpose.xlu0.b32.start [1/2] (short) (narrow) %v4364_v62, 8 }
 0x27d   :  { %1220 = vxpose.xlu0.b32.end [2/2] (short) (narrow) %v4368_v23, 8 }
 0x2c9   :  { %v4371_v0 = vpop.trf.xlu0 }
 0x2ca   :  { %3585 = vmatprep.mubr.msk.f32.mxu0 %vm609_vm4, %v4371_v0  ;;  %1599 = vxpose.xlu1.b32.start [1/3] (short) (narrow) %v4371_v0, 16 }
 0x2cd   :  { %v4376_v44 = vpop.trf.xlu1 }
 0x2ce   :  { %1631 = vxpose.xlu0.b32.start [1/3] (short) (narrow) %v4376_v44, 16  ;;  %3586 = vmatmul.mubr.msk.f32.vlgmr.msra.gmra.mrb[20].mxu0 %vm609_vm4, %v4376_v44 }
 0x2cf   :  { %3718 = vmatpush3.bf16.msra.mxu0 %v3715_v30 }
 0x2d0   :  { %3629 = vmatprep.subr.mxu0 %v1985_v45 }
 0x2d1   :  { %v4381_v1 = vpop.trf.xlu0 }
 0x2d2   :  { %3588 = vmatprep.mubr.msk.f32.mxu0 %vm609_vm4, %v4381_v1 }
 0x2d3   :  { %3630 = vmatpush3.msra.mxu0 %v1985_v45 }
 0x2d9   :  { %v4385_v38 = vpop.trf.xlu0  ;;  %v4387_v2 = vpop.trf.xlu1 }
 0x2da   :  { %3589 = vmatmul.mubr.msk.f32.gmra.mrb[22].mxu0 %vm609_vm4, %v4385_v38 }
 0x2db   :  { %3591 = vmatprep.mubr.msk.f32.mxu0 %vm609_vm4, %v4387_v2 }
 0x2e1   :  { %v4393_v63 = vpop.trf.xlu0  ;;  %v4395_v4 = vpop.trf.xlu1 }
 0x2e2   :  { %3592 = vmatmul.mubr.msk.f32.gmra.mrb[24].mxu0 %vm609_vm4, %v4393_v63 }
 0x2e3   :  { %3594 = vmatprep.mubr.msk.f32.mxu0 %vm609_vm4, %v4395_v4 }
 0x2e9   :  { %v4401_v60 = vpop.trf.xlu0  ;;  %v4403_v5 = vpop.trf.xlu1 }
 0x2ea   :  { %3595 = vmatmul.mubr.msk.f32.gmra.mrb[26].mxu0 %vm609_vm4, %v4401_v60 }
 0x2eb   :  { %3597 = vmatprep.mubr.msk.f32.mxu0 %vm609_vm4, %v4403_v5 }
 0x2f1   :  { %v4409_v14 = vpop.trf.xlu0  ;;  %v4411_v7 = vpop.trf.xlu1 }
 0x2f2   :  { %3598 = vmatmul.mubr.msk.f32.gmra.mrb[28].mxu0 %vm609_vm4, %v4409_v14 }
 0x2f3   :  { %3600 = vmatprep.mubr.msk.f32.mxu0 %vm609_vm4, %v4411_v7 }
 0x2f9   :  { %v4417_v10 = vpop.trf.xlu0 }
 0x2fa   :  { %3601 = vmatmul.mubr.msk.f32.gmra.mrb[30].mxu0 %vm609_vm4, %v4417_v10 }
 0x3a1   :  { %v3587_v52 = vpop.f32.mrb[20].mxu0 }
 0x3a2   :  { %1632 = vxpose.xlu0.b32.cont [2/3] (short) (narrow) %v3587_v52, 16  ;;  %v1355_v48 = vpop.f32.mrb[21].mxu0 }
 0x3a3   :  { %3607 = vmatprep.mubr.msk.f32.mxu1 %vm609_vm4, %v1355_v48  ;;  %1600 = vxpose.xlu1.b32.cont [2/3] (short) (narrow) %v1355_v48, 16 }
 0x3a4   :  { %3608 = vmatmul.mubr.msk.f32.vlgmr.msra.gmra.mrb[28].mxu1 %vm609_vm4, %v3587_v52 }
 0x3ad   :  { %v3590_v8 = vpop.f32.mrb[22].mxu0 }
 0x3ae   :  { %v1365_v15 = vpop.f32.mrb[23].mxu0 }
 0x3af   :  { %3610 = vmatprep.mubr.msk.f32.mxu1 %vm609_vm4, %v1365_v15 }
 0x3b0   :  { %3611 = vmatmul.mubr.msk.f32.gmra.mrb[30].mxu1 %vm609_vm4, %v3590_v8 }
 0x3b5   :  { %v3593_v20 = vpop.f32.mrb[24].mxu0 }
 0x3b6   :  { %v1375_v9 = vpop.f32.mrb[25].mxu0 }
 0x3b7   :  { %3613 = vmatprep.mubr.msk.f32.mxu1 %vm609_vm4, %v1375_v9 }
 0x3b8   :  { %3614 = vmatmul.mubr.msk.f32.gmra.mrb[32].mxu1 %vm609_vm4, %v3593_v20 }
 0x3bd   :  { %v3596_v12 = vpop.f32.mrb[26].mxu0 }
 0x3be   :  { %v1385_v17 = vpop.f32.mrb[27].mxu0 }
 0x3bf   :  { %3616 = vmatprep.mubr.msk.f32.mxu1 %vm609_vm4, %v1385_v17 }
 0x3c0   :  { %3617 = vmatmul.mubr.msk.f32.gmra.mrb[34].mxu1 %vm609_vm4, %v3596_v12 }
 0x3c5   :  { %v4429_v18 = vpop.f32.mrb[28].mxu0 }
 0x3c6   :  { %v4431_v19 = vpop.f32.mrb[29].mxu0 }
 0x3c7   :  { %3619 = vmatprep.mubr.msk.f32.mxu1 %vm609_vm4, %v4431_v19 }
 0x3c8   :  { %3620 = vmatmul.mubr.msk.f32.gmra.mrb[36].mxu1 %vm609_vm4, %v4429_v18 }
 0x3cd   :  { %v4437_v24 = vpop.f32.mrb[30].mxu0 }
 0x3ce   :  { %v4439_v26 = vpop.f32.mrb[31].mxu0 }
 0x3cf   :  { %3622 = vmatprep.mubr.msk.f32.mxu1 %vm609_vm4, %v4439_v26 }
 0x3d0   :  { %3623 = vmatmul.mubr.msk.f32.gmra.mrb[38].mxu1 %vm609_vm4, %v4437_v24 }
 0x477   :  { %v3609_v34 = vpop.f32.mrb[28].mxu1 }
 0x478   :  { %v1576_v39 = vmul.f32 2.0, %v3609_v34  ;;  %v1516_v41 = vpop.f32.mrb[29].mxu1 }
 0x479   :  { %v1575_v46 = vmul.f32 2.0, %v1516_v41 }
 0x47a   :  { %v1588_v47 = vsub.f32 %v1576_v39, %v4376_v44 }
 0x47b   :  { %v1587_v50 = vsub.f32 %v1575_v46, %v4371_v0 }
 0x47c   :  { %1633 = vxpose.xlu0.b32.end [3/3] (short) (narrow) %v1588_v47, 16 }
 0x47d   :  { %1601 = vxpose.xlu1.b32.end [3/3] (short) (narrow) %v1587_v50, 16 }
 0x480   :  { %1695 = vxpose.xlu0.b32.start [1/3] (short) (narrow) %v4385_v38, 16 }
 0x481   :  { %1663 = vxpose.xlu1.b32.start [1/3] (short) (narrow) %v4381_v1, 16 }
 0x483   :  { %v3612_v53 = vpop.f32.mrb[30].mxu1 }
 0x484   :  { %v1578_v57 = vmul.f32 2.0, %v3612_v53  ;;  %v1526_v55 = vpop.f32.mrb[31].mxu1  ;;  %1696 = vxpose.xlu0.b32.cont [2/3] (short) (narrow) %v3590_v8, 16 }
 0x485   :  { %v1577_v3 = vmul.f32 2.0, %v1526_v55  ;;  %1664 = vxpose.xlu1.b32.cont [2/3] (short) (narrow) %v1365_v15, 16 }
 0x486   :  { %v1590_v58 = vsub.f32 %v1578_v57, %v4385_v38 }
 0x487   :  { %v1589_v13 = vsub.f32 %v1577_v3, %v4381_v1 }
 0x488   :  { %1697 = vxpose.xlu0.b32.end [3/3] (short) (narrow) %v1590_v58, 16 }
 0x489   :  { %1665 = vxpose.xlu1.b32.end [3/3] (short) (narrow) %v1589_v13, 16 }
 0x48b   :  { %v3615_v44 = vpop.f32.mrb[32].mxu1 }
 0x48c   :  { %v1536_v0 = vpop.f32.mrb[33].mxu1  ;;  %1759 = vxpose.xlu0.b32.start [1/3] (short) (narrow) %v4393_v63, 16  ;;  %v1580_v52 = vmul.f32 2.0, %v3615_v44 }
 0x48d   :  { %1727 = vxpose.xlu1.b32.start [1/3] (short) (narrow) %v4387_v2, 16  ;;  %v1579_v48 = vmul.f32 2.0, %v1536_v0 }
 0x48e   :  { %v1592_v8 = vsub.f32 %v1580_v52, %v4393_v63 }
 0x48f   :  { %v1591_v15 = vsub.f32 %v1579_v48, %v4387_v2 }
 0x490   :  { %1760 = vxpose.xlu0.b32.cont [2/3] (short) (narrow) %v3593_v20, 16 }
 0x491   :  { %1728 = vxpose.xlu1.b32.cont [2/3] (short) (narrow) %v1375_v9, 16 }
 0x493   :  { %v3618_v43 = vpop.f32.mrb[34].mxu1 }
 0x494   :  { %1761 = vxpose.xlu0.b32.end [3/3] (short) (narrow) %v1592_v8, 16  ;;  %v1546_v38 = vpop.f32.mrb[35].mxu1  ;;  %v1582_v1 = vmul.f32 2.0, %v3618_v43 }
 0x495   :  { %1729 = vxpose.xlu1.b32.end [3/3] (short) (narrow) %v1591_v15, 16  ;;  %v1581_v29 = vmul.f32 2.0, %v1546_v38 }
 0x496   :  { %v1594_v20 = vsub.f32 %v1582_v1, %v4401_v60 }
 0x497   :  { %v1593_v63 = vsub.f32 %v1581_v29, %v4395_v4 }
 0x498   :  { %1823 = vxpose.xlu0.b32.start [1/3] (short) (narrow) %v4401_v60, 16 }
 0x499   :  { %1791 = vxpose.xlu1.b32.start [1/3] (short) (narrow) %v4395_v4, 16 }
 0x49b   :  { %v3621_v30 = vpop.f32.mrb[36].mxu1 }
 0x49c   :  { %1824 = vxpose.xlu0.b32.cont [2/3] (short) (narrow) %v3596_v12, 16  ;;  %v1556_v45 = vpop.f32.mrb[37].mxu1  ;;  %v1584_v34 = vmul.f32 2.0, %v3621_v30 }
 0x49d   :  { %1792 = vxpose.xlu1.b32.cont [2/3] (short) (narrow) %v1385_v17, 16  ;;  %v1583_v39 = vmul.f32 2.0, %v1556_v45 }
 0x49e   :  { %v1596_v12 = vsub.f32 %v1584_v34, %v4409_v14 }
 0x49f   :  { %v1595_v60 = vsub.f32 %v1583_v39, %v4403_v5 }
 0x4a0   :  { %1825 = vxpose.xlu0.b32.end [3/3] (short) (narrow) %v1594_v20, 16 }
 0x4a1   :  { %1793 = vxpose.xlu1.b32.end [3/3] (short) (narrow) %v1593_v63, 16  ;;  %v4512_v63 = vld [vmem:[%s5168_s7] ss:$0 sm:$0xff]  ;;  %s3899_s7 = smov 8  }
 0x4a3   :  { %v3624_v2 = vpop.f32.mrb[38].mxu1 }
 0x4a4   :  { %1887 = vxpose.xlu0.b32.start [1/3] (short) (narrow) %v4409_v14, 16  ;;  %v1566_v9 = vpop.f32.mrb[39].mxu1  ;;  %v1586_v4 = vmul.f32 2.0, %v3624_v2 }
 0x4a5   :  { %1855 = vxpose.xlu1.b32.start [1/3] (short) (narrow) %v4403_v5, 16  ;;  %v1585_v17 = vmul.f32 2.0, %v1566_v9 }
 0x4a8   :  { %1888 = vxpose.xlu0.b32.cont [2/3] (short) (narrow) %v4429_v18, 16  ;;  %v1598_v18 = vsub.f32 %v1586_v4, %v4417_v10 }
 0x4a9   :  { %1856 = vxpose.xlu1.b32.cont [2/3] (short) (narrow) %v4431_v19, 16  ;;  %v1597_v19 = vsub.f32 %v1585_v17, %v4411_v7 }
 0x4ac   :  { %1889 = vxpose.xlu0.b32.end [3/3] (short) (narrow) %v1596_v12, 16 }
 0x4ad   :  { %1857 = vxpose.xlu1.b32.end [3/3] (short) (narrow) %v1595_v60, 16  ;;  %v2473_v60 = vld [vmem:[%s5169_s8 + $0x8] sm:$0xff] }
 0x4b0   :  { %1951 = vxpose.xlu0.b32.start [1/3] (short) (narrow) %v4417_v10, 16 }
 0x4b1   :  { %1919 = vxpose.xlu1.b32.start [1/3] (short) (narrow) %v4411_v7, 16 }
 0x4b4   :  { %1952 = vxpose.xlu0.b32.cont [2/3] (short) (narrow) %v4437_v24, 16 }
 0x4b5   :  { %1920 = vxpose.xlu1.b32.cont [2/3] (short) (narrow) %v4439_v26, 16 }
 0x4b8   :  { %1953 = vxpose.xlu0.b32.end [3/3] (short) (narrow) %v1598_v18, 16 }
 0x4b9   :  { %1921 = vxpose.xlu1.b32.end [3/3] (short) (narrow) %v1597_v19, 16  ;;  %v2474_v19 = vld [vmem:[%s5169_s8 + $0x10] sm:$0xff] }
 0x4f4   :  { %v1647_v14 = vpop.trf.xlu0 }
 0x4f5   :  { %v1615_v5 = vpop.trf.xlu1 }
 0x4f6   :  { %3631 = vmatprep.mubr.msk.f32.mxu0 %vm1986_vm5, %v1615_v5 }
 0x4f8   :  { %v1648_v46 = vpop.trf.xlu0 }
 0x4f9   :  { %v1616_v41 = vpop.trf.xlu1 }
 0x4fa   :  { %3632 = vmatmul.mubr.msk.f32.vlgmr.msra.gmra.mrb[32].mxu0 %vm1986_vm5, %v1616_v41 }
 0x4fb   :  { %3634 = vmatprep.mubr.msk.f32.mxu0 %vm1986_vm5, %v1647_v14 }
 0x4fe   :  { %3635 = vmatmul.mubr.msk.f32.gmra.mrb[34].mxu0 %vm1986_vm5, %v1648_v46 }
 0x500   :  { %v1711_v26 = vpop.trf.xlu0 }
 0x501   :  { %v1679_v24 = vpop.trf.xlu1 }
 0x502   :  { %3637 = vmatprep.mubr.msk.f32.mxu0 %vm1986_vm5, %v1679_v24 }
 0x504   :  { %v1712_v10 = vpop.trf.xlu0 }
 0x505   :  { %v1680_v7 = vpop.trf.xlu1 }
 0x506   :  { %3638 = vmatmul.mubr.msk.f32.gmra.mrb[36].mxu0 %vm1986_vm5, %v1680_v7 }
 0x507   :  { %3640 = vmatprep.mubr.msk.f32.mxu0 %vm1986_vm5, %v1711_v26 }
 0x50a   :  { %3641 = vmatmul.mubr.msk.f32.gmra.mrb[38].mxu0 %vm1986_vm5, %v1712_v10 }
 0x50c   :  { %v1775_v50 = vpop.trf.xlu0 }
 0x50d   :  { %v1743_v47 = vpop.trf.xlu1 }
 0x50e   :  { %3643 = vmatprep.mubr.msk.f32.mxu0 %vm1986_vm5, %v1743_v47 }
 0x510   :  { %v1776_v57 = vpop.trf.xlu0 }
 0x511   :  { %v1744_v53 = vpop.trf.xlu1 }
 0x512   :  { %3644 = vmatmul.mubr.msk.f32.gmra.mrb[40].mxu0 %vm1986_vm5, %v1744_v53 }
 0x513   :  { %3646 = vmatprep.mubr.msk.f32.mxu0 %vm1986_vm5, %v1775_v50 }
 0x516   :  { %3647 = vmatmul.mubr.msk.f32.gmra.mrb[42].mxu0 %vm1986_vm5, %v1776_v57 }
 0x518   :  { %v1839_v3 = vpop.trf.xlu0 }
 0x519   :  { %v1807_v55 = vpop.trf.xlu1 }
 0x51a   :  { %3649 = vmatprep.mubr.msk.f32.mxu0 %vm1986_vm5, %v1807_v55 }
 0x51c   :  { %v1840_v13 = vpop.trf.xlu0 }
 0x51d   :  { %v1808_v58 = vpop.trf.xlu1 }
 0x51e   :  { %3650 = vmatmul.mubr.msk.f32.gmra.mrb[44].mxu0 %vm1986_vm5, %v1808_v58 }
 0x51f   :  { %3652 = vmatprep.mubr.msk.f32.mxu0 %vm1986_vm5, %v1839_v3 }
 0x522   :  { %3653 = vmatmul.mubr.msk.f32.gmra.mrb[46].mxu0 %vm1986_vm5, %v1840_v13 }
 0x524   :  { %v1903_v0 = vpop.trf.xlu0 }
 0x525   :  { %v1871_v44 = vpop.trf.xlu1 }
 0x526   :  { %3655 = vmatprep.mubr.msk.f32.mxu0 %vm1986_vm5, %v1871_v44 }
 0x528   :  { %v1904_v48 = vpop.trf.xlu0 }
 0x529   :  { %v1872_v52 = vpop.trf.xlu1 }
 0x52a   :  { %3656 = vmatmul.mubr.msk.f32.gmra.mrb[48].mxu0 %vm1986_vm5, %v1872_v52 }
 0x52b   :  { %3658 = vmatprep.mubr.msk.f32.mxu0 %vm1986_vm5, %v1903_v0 }
 0x52e   :  { %3659 = vmatmul.mubr.msk.f32.gmra.mrb[50].mxu0 %vm1986_vm5, %v1904_v48 }
 0x530   :  { %v1967_v15 = vpop.trf.xlu0 }
 0x531   :  { %v1935_v8 = vpop.trf.xlu1 }
 0x532   :  { %3661 = vmatprep.mubr.msk.f32.mxu0 %vm1986_vm5, %v1935_v8 }
 0x534   :  { %v1968_v38 = vpop.trf.xlu0 }
 0x535   :  { %v1936_v43 = vpop.trf.xlu1 }
 0x536   :  { %3662 = vmatmul.mubr.msk.f32.gmra.mrb[52].mxu0 %vm1986_vm5, %v1936_v43 }
 0x537   :  { %3664 = vmatprep.mubr.msk.f32.mxu0 %vm1986_vm5, %v1967_v15 }
 0x53a   :  { %3665 = vmatmul.mubr.msk.f32.gmra.mrb[54].mxu0 %vm1986_vm5, %v1968_v38 }
 0x5cd   :  { %v4504_v1 = vpop.f32.mrb[32].mxu0 }
 0x5ce   :  { %v4506_v29 = vpop.f32.mrb[33].mxu0 }
 0x5d1   :  { %v3636_v30 = vpop.f32.mrb[34].mxu0 }
 0x5d2   :  { %v2247_v45 = vadd.f32 %v3636_v30, %v4288_v21  ;;  %v2135_v20 = vpop.f32.mrb[35].mxu0  ;;  %v2472_v21 = vld [vmem:[%s5169_s8] sm:$0xff] }
 0x5d3   :  { %v2246_v2 = vadd.f32 %v2135_v20, %v4283_v25  ;;  %v3719_v25 = vpack.c.bf16 %v2473_v60, %v2472_v21 }
 0x5d4   :  { %v4516_v9 = vadd.f32 %v4512_v63, %v2247_v45 }
 0x5d5   :  { %v4519_v34 = vadd.f32 %v4512_v63, %v2246_v2  ;;  %3720 = vmatprep.subr.bf16.mxu1 %v3719_v25 }
 0x5d6   :  { %v2302_v39 = vmax.f32 %v4516_v9, 0.0  ;;  %3722 = vmatpush3.bf16.msra.mxu1 %v3719_v25 }
 0x5d7   :  { %v2301_v12 = vmax.f32 %v4519_v34, 0.0  ;;  %3671 = vmatprep.subr.mxu1 %v2474_v19 }
 0x5d8   :  { %2341 = vrot.lane.b32.xlu0 %v2302_v39, %s3899_s7 }
 0x5d9   :  { %2339 = vrot.lane.b32.xlu1 %v2301_v12, %s3899_s7  ;;  %v3639_v4 = vpop.f32.mrb[36].mxu0 }
 0x5da   :  { %v2249_v17 = vadd.f32 %v3639_v4, %v4296_v28  ;;  %v2145_v18 = vpop.f32.mrb[37].mxu0  ;;  %3672 = vmatpush3.msra.mxu1 %v2474_v19 }
 0x5db   :  { %v2248_v46 = vadd.f32 %v2145_v18, %v4291_v22 }
 0x5dc   :  { %v2280_v5 = vadd.f32 %v4512_v63, %v2249_v17 }
 0x5dd   :  { %v3642_v14 = vpop.f32.mrb[38].mxu0  ;;  %v2279_v7 = vadd.f32 %v4512_v63, %v2248_v46 }
 0x5de   :  { %v4540_v41 = vmax.f32 %v2280_v5, 0.0  ;;  %v2155_v24 = vpop.f32.mrb[39].mxu0 }
 0x5df   :  { %v2250_v26 = vadd.f32 %v2155_v24, %v4300_v33  ;;  %v4554_v47 = vmax.f32 %v2279_v7, 0.0  ;;  %v2251_v33 = vadd.f32 %v3642_v14, %v4308_v36 }
 0x5e0   :  { %2393 = vrot.lane.b32.xlu1 %v4540_v41, %s3900_s18 }
 0x5e1   :  { %v2281_v28 = vadd.f32 %v4512_v63, %v2250_v26  ;;  %v2282_v3 = vadd.f32 %v4512_v63, %v2251_v33 }
 0x5e3   :  { %v4548_v10 = vmax.f32 %v2281_v28, 0.0 }
 0x5e4   :  { %2345 = vrot.lane.b32.xlu1 %v4540_v41, %s3899_s7 }
 0x5e5   :  { %2395 = vrot.lane.b32.xlu0 %v4548_v10, %s3900_s18  ;;  %v3645_v22 = vpop.f32.mrb[40].mxu0 }
 0x5e6   :  { %v2165_v50 = vpop.f32.mrb[41].mxu0  ;;  %v2253_v36 = vadd.f32 %v3645_v22, %v4311_v37 }
 0x5e7   :  { %v2252_v53 = vadd.f32 %v2165_v50, %v4303_v35  ;;  %v4568_v35 = vmax.f32 %v2282_v3, 0.0 }
 0x5e8   :  { %2391 = vrot.lane.b32.xlu1 %v4554_v47, %s3900_s18 }
 0x5e9   :  { %v2283_v57 = vadd.f32 %v4512_v63, %v2252_v53  ;;  %2347 = vrot.lane.b32.xlu0 %v4548_v10, %s3899_s7  ;;  %v3648_v55 = vpop.f32.mrb[42].mxu0 }
 0x5ea   :  { %v2175_v58 = vpop.f32.mrb[43].mxu0  ;;  %v2255_v43 = vadd.f32 %v3648_v55, %v4324_v40 }
 0x5eb   :  { %v2307_v13 = vmax.f32 %v2283_v57, 0.0  ;;  %v2254_v44 = vadd.f32 %v2175_v58, %v4316_v42  ;;  %v2284_v42 = vadd.f32 %v4512_v63, %v2253_v36 }
 0x5ec   :  { %2343 = vrot.lane.b32.xlu1 %v4554_v47, %s3899_s7  ;;  %v2286_v20 = vadd.f32 %v4512_v63, %v2255_v43 }
 0x5ed   :  { %2399 = vrot.lane.b32.xlu0 %v2307_v13, %s3900_s18  ;;  %v2285_v0 = vadd.f32 %v4512_v63, %v2254_v44  ;;  %v2308_v15 = vmax.f32 %v2284_v42, 0.0 }
 0x5ee   :  { %v2310_v60 = vmax.f32 %v2286_v20, 0.0 }
 0x5ef   :  { %v2309_v8 = vmax.f32 %v2285_v0, 0.0 }
 0x5f0   :  { %2397 = vrot.lane.b32.xlu1 %v4568_v35, %s3900_s18 }
 0x5f1   :  { %2351 = vrot.lane.b32.xlu0 %v2307_v13, %s3899_s7  ;;  %v4575_v52 = vpop.f32.mrb[44].mxu0 }
 0x5f2   :  { %v4578_v48 = vpop.f32.mrb[45].mxu0 }
 0x5f4   :  { %2349 = vrot.lane.b32.xlu1 %v4568_v35, %s3899_s7 }
 0x5f5   :  { %2403 = vrot.lane.b32.xlu0 %v2309_v8, %s3900_s18  ;;  %v3654_v37 = vpop.f32.mrb[46].mxu0  ;;  %v2245_v8 = vadd.f32 %v4504_v1, %v4280_v31 }
 0x5f6   :  { %v2195_v38 = vpop.f32.mrb[47].mxu0  ;;  %v2259_v2 = vadd.f32 %v3654_v37, %v4340_v54 }
 0x5f7   :  { %v2258_v30 = vadd.f32 %v2195_v38, %v4332_v49  ;;  %v2276_v38 = vadd.f32 %v4512_v63, %v2245_v8 }
 0x5f8   :  { %2401 = vrot.lane.b32.xlu1 %v2308_v15, %s3900_s18  ;;  %v4597_v49 = vadd.f32 %v4512_v63, %v2259_v2 }
 0x5f9   :  { %v4587_v45 = vadd.f32 %v4512_v63, %v2258_v30 }
 0x5fa   :  { %v2314_v19 = vmax.f32 %v4597_v49, 0.0 }
 0x5fb   :  { %v2313_v21 = vmax.f32 %v4587_v45, 0.0 }
 0x5fc   :  { %2353 = vrot.lane.b32.xlu1 %v2308_v15, %s3899_s7 }
 0x5fd   :  { %2355 = vrot.lane.b32.xlu0 %v2313_v21, %s3899_s7  ;;  %v3657_v40 = vpop.f32.mrb[48].mxu0 }
 0x5fe   :  { %v2261_v25 = vadd.f32 %v3657_v40, %v4343_v6  ;;  %v2205_v4 = vpop.f32.mrb[49].mxu0  ;;  %v2300_v40 = vmax.f32 %v2276_v38, 0.0 }
 0x5ff   :  { %v2260_v17 = vadd.f32 %v2205_v4, %v4335_v59 }
 0x600   :  { %2405 = vrot.lane.b32.xlu1 %v2310_v60, %s3900_s18  ;;  %v2292_v5 = vadd.f32 %v4512_v63, %v2261_v25 }
 0x601   :  { %v2291_v54 = vadd.f32 %v4512_v63, %v2260_v17  ;;  %v3660_v18 = vpop.f32.mrb[50].mxu0 }
 0x602   :  { %v2215_v14 = vpop.f32.mrb[51].mxu0  ;;  %v4613_v59 = vmax.f32 %v2292_v5, 0.0  ;;  %v2263_v6 = vadd.f32 %v3660_v18, %v4356_v61 }
 0x603   :  { %v4605_v46 = vmax.f32 %v2291_v54, 0.0  ;;  %v2262_v24 = vadd.f32 %v2215_v14, %v4348_v56 }
 0x604   :  { %2357 = vrot.lane.b32.xlu1 %v2314_v19, %s3899_s7  ;;  %v2294_v28 = vadd.f32 %v4512_v63, %v2263_v6 }
 0x605   :  { %2407 = vrot.lane.b32.xlu0 %v4605_v46, %s3900_s18  ;;  %v2293_v26 = vadd.f32 %v4512_v63, %v2262_v24 }
 0x606   :  { %v4629_v50 = vmax.f32 %v2294_v28, 0.0 }
 0x607   :  { %v4622_v22 = vmax.f32 %v2293_v26, 0.0 }
 0x608   :  { %2409 = vrot.lane.b32.xlu1 %v4613_v59, %s3900_s18 }
 0x609   :  { %2359 = vrot.lane.b32.xlu0 %v4605_v46, %s3899_s7  ;;  %v3663_v56 = vpop.f32.mrb[52].mxu0 }
 0x60a   :  { %v2225_v7 = vpop.f32.mrb[53].mxu0  ;;  %v2265_v53 = vadd.f32 %v3663_v56, %v4359_v27 }
 0x60b   :  { %v2264_v33 = vadd.f32 %v2225_v7, %v4351_v16 }
 0x60c   :  { %2361 = vrot.lane.b32.xlu1 %v4613_v59, %s3899_s7  ;;  %v2296_v16 = vadd.f32 %v4512_v63, %v2265_v53  ;;  %v2257_v53 = vadd.f32 %v4575_v52, %v4327_v51 }
 0x60d   :  { %2411 = vrot.lane.b32.xlu0 %v4622_v22, %s3900_s18  ;;  %v3666_v61 = vpop.f32.mrb[54].mxu0  ;;  %v2295_v55 = vadd.f32 %v4512_v63, %v2264_v33  ;;  %v2256_v33 = vadd.f32 %v4578_v48, %v4319_v32 }
 0x60e   :  { %v2235_v57 = vpop.f32.mrb[55].mxu0  ;;  %v2320_v27 = vmax.f32 %v2296_v16, 0.0  ;;  %v2267_v13 = vadd.f32 %v3666_v61, %v4368_v23  ;;  %v2244_v23 = vadd.f32 %v4506_v29, %v4276_v11 }
 0x60f   :  { %v2319_v3 = vmax.f32 %v2295_v55, 0.0  ;;  %v2266_v58 = vadd.f32 %v2235_v57, %v4364_v62 }
 0x610   :  { %2413 = vrot.lane.b32.xlu1 %v4629_v50, %s3900_s18  ;;  %v2298_v36 = vadd.f32 %v4512_v63, %v2267_v13  ;;  %v2275_v43 = vadd.f32 %v4512_v63, %v2244_v23 }
 0x611   :  { %2363 = vrot.lane.b32.xlu0 %v4622_v22, %s3899_s7  ;;  %v2297_v44 = vadd.f32 %v4512_v63, %v2266_v58 }
 0x612   :  { %v2322_v62 = vmax.f32 %v2298_v36, 0.0  ;;  %v2299_v2 = vmax.f32 %v2275_v43, 0.0 }
 0x613   :  { %v2321_v0 = vmax.f32 %v2297_v44, 0.0 }
 0x614   :  { %2365 = vrot.lane.b32.xlu1 %v4629_v50, %s3899_s7 }
 0x615   :  { %2415 = vrot.lane.b32.xlu0 %v2319_v3, %s3900_s18 }
 0x618   :  { %2417 = vrot.lane.b32.xlu1 %v2320_v27, %s3900_s18 }
 0x619   :  { %2367 = vrot.lane.b32.xlu0 %v2319_v3, %s3899_s7  ;;  %v2288_v3 = vadd.f32 %v4512_v63, %v2257_v53 }
 0x61b   :  { %v2312_v13 = vmax.f32 %v2288_v3, 0.0 }
 0x61c   :  { %2369 = vrot.lane.b32.xlu1 %v2320_v27, %s3899_s7 }
 0x61d   :  { %2419 = vrot.lane.b32.xlu0 %v2321_v0, %s3900_s18 }
 0x620   :  { %2421 = vrot.lane.b32.xlu1 %v2322_v62, %s3900_s18 }
 0x64a   :  { %v2342_v15 = vpop.permute.xlu0 %2341 }
 0x64b   :  { %v2340_v42 = vpop.permute.xlu1 %2339  ;;  %v2441_v4 = vsel %vm2439_vm6, %v2300_v40, %v2342_v15 }
 0x64c   :  { %v2440_v60 = vsel %vm2439_vm6, %v2299_v2, %v2340_v42 }
 0x652   :  { %v2394_v37 = vpop.permute.xlu1 %2393 }
 0x653   :  { %v2457_v31 = vsel %vm609_vm4, %v2441_v4, %v2394_v37 }
 0x656   :  { %v2346_v30 = vpop.permute.xlu1 %2345 }
 0x657   :  { %v2396_v20 = vpop.permute.xlu0 %2395  ;;  %v2443_v5 = vsel %vm2439_vm6, %v2302_v39, %v2346_v30 }
 0x65a   :  { %v2392_v25 = vpop.permute.xlu1 %2391 }
 0x65b   :  { %v2456_v11 = vsel %vm609_vm4, %v2440_v60, %v2392_v25  ;;  %v2348_v29 = vpop.permute.xlu0 %2347 }
 0x65c   :  { %3673 = vmatprep.mubr.msk.f32.mxu1 %vm1986_vm5, %v2456_v11  ;;  %v2444_v24 = vsel %vm2439_vm6, %v4554_v47, %v2348_v29  ;;  %v4729_v11 = vld [vmem:[%s5170_s9] ss:$0 sm:$0xff]  ;;  %s3901_s9 = smov 32  }
 0x65d   :  { %3674 = vmatmul.mubr.msk.f32.vlgmr.msra.gmra.mrb[40].mxu1 %vm1986_vm5, %v2457_v31 }
 0x65e   :  { %v2344_v1 = vpop.permute.xlu1 %2343 }
 0x65f   :  { %v2442_v17 = vsel %vm2439_vm6, %v2301_v12, %v2344_v1  ;;  %v2400_v54 = vpop.permute.xlu0 %2399 }
 0x660   :  { %v2458_v18 = vsel %vm609_vm4, %v2442_v17, %v2396_v20  ;;  %v2460_v34 = vsel %vm609_vm4, %v2444_v24, %v2400_v54 }
 0x661   :  { %3676 = vmatprep.mubr.msk.f32.mxu1 %vm1986_vm5, %v2458_v18 }
 0x662   :  { %v2398_v14 = vpop.permute.xlu1 %2397 }
 0x663   :  { %v2459_v6 = vsel %vm609_vm4, %v2443_v5, %v2398_v14  ;;  %v2352_v26 = vpop.permute.xlu0 %2351 }
 0x664   :  { %3677 = vmatmul.mubr.msk.f32.gmra.mrb[42].mxu1 %vm1986_vm5, %v2459_v6  ;;  %v2446_v39 = vsel %vm2439_vm6, %v4548_v10, %v2352_v26 }
 0x665   :  { %3679 = vmatprep.mubr.msk.f32.mxu1 %vm1986_vm5, %v2460_v34 }
 0x666   :  { %v2350_v12 = vpop.permute.xlu1 %2349 }
 0x667   :  { %v2404_v56 = vpop.permute.xlu0 %2403  ;;  %v2445_v9 = vsel %vm2439_vm6, %v4540_v41, %v2350_v12  ;;  %v2287_v41 = vadd.f32 %v4512_v63, %v2256_v33 }
 0x668   :  { %v2462_v7 = vsel %vm609_vm4, %v2446_v39, %v2404_v56 }
 0x669   :  { %v2311_v32 = vmax.f32 %v2287_v41, 0.0 }
 0x66a   :  { %v2402_v28 = vpop.permute.xlu1 %2401 }
 0x66b   :  { %v2461_v47 = vsel %vm609_vm4, %v2445_v9, %v2402_v28 }
 0x66c   :  { %3680 = vmatmul.mubr.msk.f32.gmra.mrb[44].mxu1 %vm1986_vm5, %v2461_v47 }
 0x66d   :  { %3682 = vmatprep.mubr.msk.f32.mxu1 %vm1986_vm5, %v2462_v7 }
 0x66e   :  { %v2354_v61 = vpop.permute.xlu1 %2353 }
 0x66f   :  { %v2447_v10 = vsel %vm2439_vm6, %v4568_v35, %v2354_v61  ;;  %v2356_v55 = vpop.permute.xlu0 %2355 }
 0x670   :  { %v2448_v58 = vsel %vm2439_vm6, %v2311_v32, %v2356_v55 }
 0x672   :  { %v2406_v57 = vpop.permute.xlu1 %2405 }
 0x673   :  { %v2463_v16 = vsel %vm609_vm4, %v2447_v10, %v2406_v57 }
 0x674   :  { %3683 = vmatmul.mubr.msk.f32.gmra.mrb[46].mxu1 %vm1986_vm5, %v2463_v16 }
 0x676   :  { %v2358_v48 = vpop.permute.xlu1 %2357 }
 0x677   :  { %v2408_v27 = vpop.permute.xlu0 %2407  ;;  %v2449_v35 = vsel %vm2439_vm6, %v2312_v13, %v2358_v48 }
 0x678   :  { %v2464_v51 = vsel %vm609_vm4, %v2448_v58, %v2408_v27 }
 0x679   :  { %3685 = vmatprep.mubr.msk.f32.mxu1 %vm1986_vm5, %v2464_v51 }
 0x67a   :  { %v2410_v52 = vpop.permute.xlu1 %2409 }
 0x67b   :  { %v2465_v44 = vsel %vm609_vm4, %v2449_v35, %v2410_v52  ;;  %v2360_v36 = vpop.permute.xlu0 %2359 }
 0x67c   :  { %3686 = vmatmul.mubr.msk.f32.gmra.mrb[48].mxu1 %vm1986_vm5, %v2465_v44  ;;  %v2450_v0 = vsel %vm2439_vm6, %v2313_v21, %v2360_v36 }
 0x67e   :  { %v2362_v63 = vpop.permute.xlu1 %2361 }
 0x67f   :  { %v2412_v62 = vpop.permute.xlu0 %2411  ;;  %v2451_v23 = vsel %vm2439_vm6, %v2314_v19, %v2362_v63 }
 0x680   :  { %v2466_v42 = vsel %vm609_vm4, %v2450_v0, %v2412_v62 }
 0x681   :  { %3688 = vmatprep.mubr.msk.f32.mxu1 %vm1986_vm5, %v2466_v42 }
 0x682   :  { %v2414_v8 = vpop.permute.xlu1 %2413 }
 0x683   :  { %v2467_v37 = vsel %vm609_vm4, %v2451_v23, %v2414_v8  ;;  %v2364_v15 = vpop.permute.xlu0 %2363 }
 0x684   :  { %3689 = vmatmul.mubr.msk.f32.gmra.mrb[50].mxu1 %vm1986_vm5, %v2467_v37  ;;  %v2452_v45 = vsel %vm2439_vm6, %v4605_v46, %v2364_v15 }
 0x686   :  { %v2366_v43 = vpop.permute.xlu1 %2365 }
 0x687   :  { %v2416_v21 = vpop.permute.xlu0 %2415  ;;  %v2453_v49 = vsel %vm2439_vm6, %v4613_v59, %v2366_v43 }
 0x688   :  { %v2468_v38 = vsel %vm609_vm4, %v2452_v45, %v2416_v21 }
 0x689   :  { %3691 = vmatprep.mubr.msk.f32.mxu1 %vm1986_vm5, %v2468_v38 }
 0x68a   :  { %v2418_v30 = vpop.permute.xlu1 %2417 }
 0x68b   :  { %v2469_v19 = vsel %vm609_vm4, %v2453_v49, %v2418_v30  ;;  %v2368_v20 = vpop.permute.xlu0 %2367 }
 0x68c   :  { %3692 = vmatmul.mubr.msk.f32.gmra.mrb[52].mxu1 %vm1986_vm5, %v2469_v19  ;;  %v2454_v40 = vsel %vm2439_vm6, %v4622_v22, %v2368_v20 }
 0x68e   :  { %v2370_v2 = vpop.permute.xlu1 %2369 }
 0x68f   :  { %v2420_v60 = vpop.permute.xlu0 %2419  ;;  %v2455_v25 = vsel %vm2439_vm6, %v4629_v50, %v2370_v2 }
 0x690   :  { %v2470_v46 = vsel %vm609_vm4, %v2454_v40, %v2420_v60 }
 0x691   :  { %3694 = vmatprep.mubr.msk.f32.mxu1 %vm1986_vm5, %v2470_v46 }
 0x692   :  { %v2422_v4 = vpop.permute.xlu1 %2421 }
 0x693   :  { %v2471_v59 = vsel %vm609_vm4, %v2455_v25, %v2422_v4 }
 0x694   :  { %3695 = vmatmul.mubr.msk.f32.gmra.mrb[54].mxu1 %vm1986_vm5, %v2471_v59 }
 0x730   :  { %v3675_v29 = vpop.f32.mrb[40].mxu1 }
 0x731   :  { %v4732_v22 = vadd.f32 %v3675_v29, %v4729_v11  ;;  %v2596_v31 = vpop.f32.mrb[41].mxu1 }
 0x732   :  { %v4735_v1 = vadd.f32 %v4729_v11, %v2596_v31 }
 0x733   :  { %v3360_v50 = vmul.f32 -1.442695, %v4732_v22 }
 0x734   :  { %v3359_v17 = vmul.f32 -1.442695, %v4735_v1 }
 0x735   :  { %3831 = vpow2.f32 %v3360_v50 }
 0x736   :  { %3833 = vpow2.f32 %v3359_v17 }
 0x737   :  { %v3678_v54 = vpop.f32.mrb[42].mxu1 }
 0x738   :  { %v4740_v18 = vadd.f32 %v3678_v54, %v4729_v11  ;;  %v2606_v5 = vpop.f32.mrb[43].mxu1 }
 0x739   :  { %v4743_v14 = vadd.f32 %v4729_v11, %v2606_v5 }
 0x73a   :  { %v3362_v24 = vmul.f32 -1.442695, %v4740_v18 }
 0x73b   :  { %v3361_v6 = vmul.f32 -1.442695, %v4743_v14 }
 0x73c   :  { %3835 = vpow2.f32 %v3362_v24 }
 0x73d   :  { %3837 = vpow2.f32 %v3361_v6 }
 0x73f   :  { %v3832_v26 = vpop.eup %3831  ;;  %v3681_v34 = vpop.f32.mrb[44].mxu1 }
 0x740   :  { %v3834_v12 = vpop.eup %3833  ;;  %v2724_v56 = vadd.f32 1.0, %v3832_v26  ;;  %v4748_v9 = vadd.f32 %v3681_v34, %v4729_v11  ;;  %v2616_v28 = vpop.f32.mrb[45].mxu1 }
 0x741   :  { %v2723_v39 = vadd.f32 1.0, %v3834_v12  ;;  %v4751_v47 = vadd.f32 %v4729_v11, %v2616_v28 }
 0x742   :  { %3839 = vrcp.f32 %v2724_v56  ;;  %v3364_v7 = vmul.f32 -1.442695, %v4748_v9 }
 0x743   :  { %3841 = vrcp.f32 %v2723_v39  ;;  %v3363_v33 = vmul.f32 -1.442695, %v4751_v47 }
 0x744   :  { %3843 = vpow2.f32 %v3364_v7 }
 0x745   :  { %3845 = vpow2.f32 %v3363_v33 }
 0x746   :  { %v3836_v61 = vpop.eup %3835 }
 0x747   :  { %v3838_v53 = vpop.eup %3837  ;;  %v2726_v41 = vadd.f32 1.0, %v3836_v61  ;;  %v3684_v10 = vpop.f32.mrb[46].mxu1 }
 0x748   :  { %v2725_v57 = vadd.f32 1.0, %v3838_v53  ;;  %v4756_v55 = vadd.f32 %v3684_v10, %v4729_v11  ;;  %v2626_v16 = vpop.f32.mrb[47].mxu1 }
 0x749   :  { %3847 = vrcp.f32 %v2726_v41  ;;  %v4759_v3 = vadd.f32 %v4729_v11, %v2626_v16 }
 0x74a   :  { %3849 = vrcp.f32 %v2725_v57  ;;  %v3366_v32 = vmul.f32 -1.442695, %v4756_v55 }
 0x74b   :  { %v3365_v48 = vmul.f32 -1.442695, %v4759_v3 }
 0x74c   :  { %v3840_v58 = vpop.eup %3839  ;;  %3851 = vpow2.f32 %v3366_v32 }
 0x74d   :  { %v3842_v27 = vpop.eup %3841  ;;  %3853 = vpow2.f32 %v3365_v48  ;;  %2789 = vrot.lane.b32.xlu1 %v3840_v58, %s3898_s0 }
 0x74e   :  { %v3844_v13 = vpop.eup %3843  ;;  %2787 = vrot.lane.b32.xlu0 %v3842_v27, %s3898_s0 }
 0x74f   :  { %v3846_v51 = vpop.eup %3845  ;;  %v2728_v35 = vadd.f32 1.0, %v3844_v13  ;;  %v3687_v52 = vpop.f32.mrb[48].mxu1 }
 0x750   :  { %v2727_v44 = vadd.f32 1.0, %v3846_v51  ;;  %v4766_v36 = vadd.f32 %v3687_v52, %v4729_v11  ;;  %v2636_v63 = vpop.f32.mrb[49].mxu1 }
 0x751   :  { %3855 = vrcp.f32 %v2728_v35  ;;  %v4769_v0 = vadd.f32 %v4729_v11, %v2636_v63 }
 0x752   :  { %3857 = vrcp.f32 %v2727_v44  ;;  %v3368_v62 = vmul.f32 -1.442695, %v4766_v36 }
 0x753   :  { %v3848_v42 = vpop.eup %3847  ;;  %v3367_v23 = vmul.f32 -1.442695, %v4769_v0 }
 0x754   :  { %v3850_v8 = vpop.eup %3849  ;;  %3859 = vpow2.f32 %v3368_v62  ;;  %2793 = vrot.lane.b32.xlu1 %v3848_v42, %s3898_s0 }
 0x755   :  { %3861 = vpow2.f32 %v3367_v23  ;;  %2791 = vrot.lane.b32.xlu0 %v3850_v8, %s3898_s0 }
 0x756   :  { %v3852_v37 = vpop.eup %3851 }
 0x757   :  { %v3854_v15 = vpop.eup %3853  ;;  %v2730_v43 = vadd.f32 1.0, %v3852_v37  ;;  %v3690_v45 = vpop.f32.mrb[50].mxu1 }
 0x758   :  { %v2729_v21 = vadd.f32 1.0, %v3854_v15  ;;  %v4776_v38 = vadd.f32 %v3690_v45, %v4729_v11  ;;  %v2646_v49 = vpop.f32.mrb[51].mxu1 }
 0x759   :  { %3863 = vrcp.f32 %v2730_v43  ;;  %v4779_v30 = vadd.f32 %v4729_v11, %v2646_v49 }
 0x75a   :  { %3865 = vrcp.f32 %v2729_v21  ;;  %v3370_v19 = vmul.f32 -1.442695, %v4776_v38 }
 0x75b   :  { %v3856_v20 = vpop.eup %3855  ;;  %v3369_v2 = vmul.f32 -1.442695, %v4779_v30 }
 0x75c   :  { %v3858_v40 = vpop.eup %3857  ;;  %3867 = vpow2.f32 %v3370_v19  ;;  %2797 = vrot.lane.b32.xlu1 %v3856_v20, %s3898_s0 }
 0x75d   :  { %3869 = vpow2.f32 %v3369_v2  ;;  %2795 = vrot.lane.b32.xlu0 %v3858_v40, %s3898_s0 }
 0x75e   :  { %v3860_v60 = vpop.eup %3859 }
 0x75f   :  { %v3862_v46 = vpop.eup %3861  ;;  %v2732_v25 = vadd.f32 1.0, %v3860_v60  ;;  %v3693_v4 = vpop.f32.mrb[52].mxu1 }
 0x760   :  { %v2731_v59 = vadd.f32 1.0, %v3862_v46  ;;  %v4786_v29 = vadd.f32 %v3693_v4, %v4729_v11  ;;  %v2656_v31 = vpop.f32.mrb[53].mxu1 }
 0x761   :  { %3871 = vrcp.f32 %v2732_v25  ;;  %v4789_v50 = vadd.f32 %v4729_v11, %v2656_v31 }
 0x762   :  { %3873 = vrcp.f32 %v2731_v59  ;;  %v3372_v17 = vmul.f32 -1.442695, %v4786_v29 }
 0x763   :  { %v3864_v54 = vpop.eup %3863  ;;  %v3371_v5 = vmul.f32 -1.442695, %v4789_v50 }
 0x764   :  { %v3866_v24 = vpop.eup %3865  ;;  %3875 = vpow2.f32 %v3372_v17  ;;  %2801 = vrot.lane.b32.xlu1 %v3864_v54, %s3898_s0 }
 0x765   :  { %3877 = vpow2.f32 %v3371_v5  ;;  %2799 = vrot.lane.b32.xlu0 %v3866_v24, %s3898_s0 }
 0x766   :  { %v3868_v6 = vpop.eup %3867 }
 0x767   :  { %v3870_v26 = vpop.eup %3869  ;;  %v2734_v34 = vadd.f32 1.0, %v3868_v6  ;;  %v3696_v12 = vpop.f32.mrb[54].mxu1 }
 0x768   :  { %v2733_v56 = vadd.f32 1.0, %v3870_v26  ;;  %v4796_v28 = vadd.f32 %v3696_v12, %v4729_v11  ;;  %v2666_v39 = vpop.f32.mrb[55].mxu1 }
 0x769   :  { %3879 = vrcp.f32 %v2734_v34  ;;  %v4799_v7 = vadd.f32 %v4729_v11, %v2666_v39 }
 0x76a   :  { %3881 = vrcp.f32 %v2733_v56  ;;  %v3374_v33 = vmul.f32 -1.442695, %v4796_v28 }
 0x76b   :  { %v3872_v61 = vpop.eup %3871  ;;  %v3373_v53 = vmul.f32 -1.442695, %v4799_v7 }
 0x76c   :  { %v3874_v41 = vpop.eup %3873  ;;  %3883 = vpow2.f32 %v3374_v33  ;;  %2805 = vrot.lane.b32.xlu1 %v3872_v61, %s3898_s0 }
 0x76d   :  { %3885 = vpow2.f32 %v3373_v53  ;;  %2803 = vrot.lane.b32.xlu0 %v3874_v41, %s3898_s0 }
 0x76e   :  { %v3876_v10 = vpop.eup %3875 }
 0x76f   :  { %v3878_v57 = vpop.eup %3877  ;;  %v2736_v16 = vadd.f32 1.0, %v3876_v10 }
 0x770   :  { %v2735_v32 = vadd.f32 1.0, %v3878_v57 }
 0x771   :  { %3887 = vrcp.f32 %v2736_v16 }
 0x772   :  { %3889 = vrcp.f32 %v2735_v32 }
 0x773   :  { %v3880_v11 = vpop.eup %3879 }
 0x774   :  { %v3882_v48 = vpop.eup %3881  ;;  %2809 = vrot.lane.b32.xlu1 %v3880_v11, %s3898_s0 }
 0x775   :  { %2807 = vrot.lane.b32.xlu0 %v3882_v48, %s3898_s0 }
 0x776   :  { %v3884_v58 = vpop.eup %3883 }
 0x777   :  { %v3886_v27 = vpop.eup %3885  ;;  %v2738_v13 = vadd.f32 1.0, %v3884_v58 }
 0x778   :  { %v2737_v51 = vadd.f32 1.0, %v3886_v27 }
 0x779   :  { %3891 = vrcp.f32 %v2738_v13 }
 0x77a   :  { %3893 = vrcp.f32 %v2737_v51 }
 0x77b   :  { %v3888_v35 = vpop.eup %3887 }
 0x77c   :  { %v3890_v52 = vpop.eup %3889  ;;  %2813 = vrot.lane.b32.xlu1 %v3888_v35, %s3898_s0 }
 0x77d   :  { %2811 = vrot.lane.b32.xlu0 %v3890_v52, %s3898_s0 }
 0x783   :  { %v3892_v44 = vpop.eup %3891 }
 0x784   :  { %v3894_v63 = vpop.eup %3893  ;;  %2817 = vrot.lane.b32.xlu1 %v3892_v44, %s3898_s0 }
 0x785   :  { %2815 = vrot.lane.b32.xlu0 %v3894_v63, %s3898_s0 }
 0x7bf   :  { %v2790_v62 = vpop.permute.xlu1 %2789 }
 0x7c0   :  { %v2788_v42 = vpop.permute.xlu0 %2787  ;;  %v4818_v43 = vmul.f32 %v2790_v62, %v4732_v22 }
 0x7c1   :  { %v4821_v45 = vmul.f32 %v2788_v42, %v4735_v1 }
 0x7c2   :  { %v3040_v31 = vrot.slane %v4818_v43, 2  ;;  %v3057_v5 = vrot.slane %v4818_v43, 3  ;;  %v3074_v24 = vrot.slane %v4818_v43, 4  ;;  %v3091_v26 = vrot.slane %v4818_v43, 5 }
 0x7c3   :  { %v2881_v17 = vrot.slane %v4821_v45, 1  ;;  %v2898_v54 = vrot.slane %v4821_v45, 2  ;;  %v2915_v6 = vrot.slane %v4821_v45, 3  ;;  %v3108_v34 = vrot.slane %v4818_v43, 6 }
 0x7c4   :  { %v2966_v12 = vrot.slane %v4821_v45, 6  ;;  %v3125_v56 = vrot.slane %v4818_v43, 7  ;;  %v2983_v39 = vrot.slane %v4821_v45, 7 }
 0x7c6   :  { %v2794_v23 = vpop.permute.xlu1 %2793 }
 0x7c7   :  { %v2792_v8 = vpop.permute.xlu0 %2791  ;;  %v4812_v37 = vmul.f32 %v2794_v23, %v4740_v18 }
 0x7c8   :  { %v4815_v15 = vmul.f32 %v2792_v8, %v4743_v14 }
 0x7c9   :  { %v3008_v21 = vrot.slane %v4812_v37, 7  ;;  %v3041_v33 = vrot.slane %v4812_v37, 1  ;;  %v3058_v61 = vrot.slane %v4812_v37, 2  ;;  %v3075_v11 = vrot.slane %v4812_v37, 3 }
 0x7ca   :  { %v2859_v49 = vrot.slane %v4815_v15, 7  ;;  %v2899_v16 = vrot.slane %v4815_v15, 1  ;;  %v2916_v32 = vrot.slane %v4815_v15, 2  ;;  %v2933_v48 = vrot.slane %v4815_v15, 3 }
 0x7cb   :  { %v3009_v18 = vsel %vm2860_vm7, %v3008_v21, %v4818_v43  ;;  %v3092_v58 = vrot.slane %v4812_v37, 4  ;;  %v2950_v27 = vrot.slane %v4815_v15, 4  ;;  %v2882_v52 = vsel %vm2860_vm7, %v4815_v15, %v2881_v17 }
 0x7cc   :  { %v2861_v14 = vsel %vm2860_vm7, %v2859_v49, %v4821_v45  ;;  %v3109_v44 = vrot.slane %v4812_v37, 5  ;;  %v2967_v63 = vrot.slane %v4815_v15, 5  ;;  %v3042_v23 = vsel %vm2860_vm7, %v3041_v33, %v3040_v31 }
 0x7cd   :  { %v3059_v8 = vsel %vm2860_vm7, %v3058_v61, %v3057_v5  ;;  %v3126_v21 = vrot.slane %v4812_v37, 6  ;;  %v2984_v49 = vrot.slane %v4815_v15, 6 }
 0x7ce   :  { %v2798_v19 = vpop.permute.xlu1 %2797 }
 0x7cf   :  { %v2796_v20 = vpop.permute.xlu0 %2795  ;;  %v4830_v2 = vmul.f32 %v2798_v19, %v4748_v9  ;;  %v2917_v19 = vsel %vm2860_vm7, %v2916_v32, %v2915_v6  ;;  %v3127_v31 = vsel %vm2860_vm7, %v3126_v21, %v3125_v56  ;;  %v2985_v17 = vsel %vm2860_vm7, %v2984_v49, %v2983_v39 }
 0x7d0   :  { %v4833_v22 = vmul.f32 %v2796_v20, %v4751_v47  ;;  %v3023_v47 = vrot.slane %v4818_v43, 1  ;;  %v2900_v43 = vsel %vm2860_vm7, %v2899_v16, %v2898_v54  ;;  %v3093_v20 = vsel %vm2860_vm7, %v3092_v58, %v3091_v26 }
 0x7d1   :  { %v3010_v1 = vrot.slane %v4830_v2, 6  ;;  %v3077_v15 = vrot.slane %v4830_v2, 2  ;;  %v3094_v54 = vrot.slane %v4830_v2, 3  ;;  %v3043_v26 = vsel %vm2863_vm8, %v4830_v2, %v3042_v23 }
 0x7d2   :  { %v2862_v40 = vrot.slane %v4833_v22, 6  ;;  %v3024_v35 = vsel %vm2860_vm7, %v4812_v37, %v3023_v47  ;;  %v2883_v37 = vrot.slane %v4833_v22, 7  ;;  %v2935_v47 = vrot.slane %v4833_v22, 2 }
 0x7d3   :  { %v3011_v25 = vsel %vm2863_vm8, %v3010_v1, %v3009_v18  ;;  %v3025_v18 = vrot.slane %v4830_v2, 7  ;;  %v3110_v1 = vsel %vm2860_vm7, %v3109_v44, %v3108_v34  ;;  %v2952_v5 = vrot.slane %v4833_v22, 3 }
 0x7d4   :  { %v2864_v4 = vsel %vm2863_vm8, %v2862_v40, %v2861_v14  ;;  %v3060_v14 = vrot.slane %v4830_v2, 1  ;;  %v2968_v40 = vsel %vm2860_vm7, %v2967_v63, %v2966_v12  ;;  %v2884_v56 = vsel %vm2863_vm8, %v2883_v37, %v2882_v52 }
 0x7d5   :  { %v3111_v33 = vrot.slane %v4830_v2, 4  ;;  %v3095_v32 = vsel %vm2863_vm8, %v3094_v54, %v3093_v20 }
 0x7d6   :  { %v2802_v60 = vpop.permute.xlu1 %2801  ;;  %v3061_v34 = vsel %vm2863_vm8, %v3060_v14, %v3059_v8 }
 0x7d7   :  { %v2800_v46 = vpop.permute.xlu0 %2799  ;;  %v4840_v59 = vmul.f32 %v2802_v60, %v4756_v55  ;;  %v2932_v55 = vrot.slane %v4821_v45, 4 }
 0x7d8   :  { %v4843_v9 = vmul.f32 %v2800_v46, %v4759_v3  ;;  %v2949_v3 = vrot.slane %v4821_v45, 5  ;;  %v3076_v45 = vsel %vm2860_vm7, %v3075_v11, %v3074_v24 }
 0x7d9   :  { %v3012_v53 = vrot.slane %v4840_v59, 5  ;;  %v3078_v39 = vsel %vm2863_vm8, %v3077_v15, %v3076_v45  ;;  %v3027_v16 = vrot.slane %v4840_v59, 6  ;;  %v3044_v58 = vrot.slane %v4840_v59, 7 }
 0x7da   :  { %v2865_v41 = vrot.slane %v4843_v9, 5  ;;  %v3096_v44 = vrot.slane %v4840_v59, 2  ;;  %v3062_v45 = vsel %vm2866_vm9, %v4840_v59, %v3061_v34 }
 0x7db   :  { %v3013_v13 = vsel %vm2866_vm9, %v3012_v53, %v3011_v25 }
 0x7dc   :  { %v2867_v51 = vsel %vm2866_vm9, %v2865_v41, %v2864_v4  ;;  %v2918_v4 = vrot.slane %v4833_v22, 1  ;;  %v2969_v41 = vrot.slane %v4833_v22, 4 }
 0x7de   :  { %v2806_v10 = vpop.permute.xlu1 %2805  ;;  %v2919_v53 = vsel %vm2863_vm8, %v2918_v4, %v2917_v19  ;;  %v4947_v63 = vsel %vm2863_vm8, %v2969_v41, %v2968_v40  ;;  %v2971_v4 = vrot.slane %v4843_v9, 3 }
 0x7df   :  { %v2804_v57 = vpop.permute.xlu0 %2803  ;;  %v4878_v62 = vmul.f32 %v2806_v10, %v4766_v36  ;;  %v2934_v36 = vsel %vm2860_vm7, %v2933_v48, %v2932_v55  ;;  %v3026_v55 = vsel %vm2863_vm8, %v3025_v18, %v3024_v35  ;;  %v3128_v10 = vrot.slane %v4830_v2, 5 }
 0x7e0   :  { %v4881_v42 = vmul.f32 %v2804_v57, %v4769_v0  ;;  %v2951_v0 = vsel %vm2860_vm7, %v2950_v27, %v2949_v3  ;;  %v2901_v3 = vsel %vm2863_vm8, %v4833_v22, %v2900_v43  ;;  %v2986_v57 = vrot.slane %v4833_v22, 5 }
 0x7e1   :  { %v3014_v60 = vrot.slane %v4878_v62, 4  ;;  %v4931_v11 = vsel %vm2863_vm8, %v2952_v5, %v2951_v0  ;;  %v2885_v48 = vrot.slane %v4843_v9, 6  ;;  %v2902_v27 = vrot.slane %v4843_v9, 7 }
 0x7e2   :  { %v2868_v46 = vrot.slane %v4881_v42, 4  ;;  %v2937_v22 = vrot.slane %v4843_v9, 1  ;;  %v4950_v23 = vsel %vm2863_vm8, %v3128_v10, %v3127_v31  ;;  %v3028_v43 = vsel %vm2866_vm9, %v3027_v16, %v3026_v55 }
 0x7e3   :  { %v3015_v24 = vsel %vm2869_vm10, %v3014_v60, %v3013_v13  ;;  %v3079_v13 = vrot.slane %v4840_v59, 1  ;;  %v4960_v21 = vsel %vm2866_vm9, %v4843_v9, %v2919_v53  ;;  %v2886_v19 = vsel %vm2866_vm9, %v2885_v48, %v2884_v56 }
 0x7e4   :  { %v4909_v6 = vsel %vm2869_vm10, %v2868_v46, %v2867_v51  ;;  %v4942_v51 = vsel %vm2863_vm8, %v3111_v33, %v3110_v1  ;;  %v2903_v20 = vsel %vm2866_vm9, %v2902_v27, %v2901_v3  ;;  %v2954_v1 = vrot.slane %v4843_v9, 2 }
 0x7e5   :  { %v4967_v0 = vsel %vm2866_vm9, %v3079_v13, %v3078_v39  ;;  %v3029_v15 = vrot.slane %v4878_v62, 5  ;;  %v3046_v60 = vrot.slane %v4878_v62, 6  ;;  %v4983_v46 = vsel %vm2866_vm9, %v3096_v44, %v3095_v32 }
 0x7e6   :  { %v2810_v25 = vpop.permute.xlu1 %2809  ;;  %v3063_v54 = vrot.slane %v4878_v62, 7  ;;  %v2921_v55 = vrot.slane %v4881_v42, 7 }
 0x7e7   :  { %v4918_v12 = vmul.f32 %v2810_v25, %v4776_v38  ;;  %v2808_v61 = vpop.permute.xlu0 %2807  ;;  %v2936_v38 = vsel %vm2863_vm8, %v2935_v47, %v2934_v36  ;;  %v3045_v36 = vsel %vm2866_vm9, %v3044_v58, %v3043_v26  ;;  %v3113_v25 = vrot.slane %v4840_v59, 3 }
 0x7e8   :  { %v4938_v2 = vmul.f32 %v2808_v61, %v4779_v30  ;;  %v4953_v30 = vsel %vm2863_vm8, %v2986_v57, %v2985_v17  ;;  %v4973_v14 = vsel %vm2866_vm9, %v2937_v22, %v2936_v38  ;;  %v3130_v47 = vrot.slane %v4840_v59, 4 }
 0x7e9   :  { %v3016_v35 = vrot.slane %v4918_v12, 3  ;;  %v3031_v31 = vrot.slane %v4918_v12, 4  ;;  %v2904_v17 = vrot.slane %v4881_v42, 6  ;;  %v3030_v39 = vsel %vm2869_vm10, %v3029_v15, %v3028_v43 }
 0x7ea   :  { %v2871_v40 = vrot.slane %v4938_v2, 3  ;;  %v3047_v61 = vsel %vm2869_vm10, %v3046_v60, %v3045_v36  ;;  %v3048_v10 = vrot.slane %v4918_v12, 5  ;;  %v2906_v38 = vrot.slane %v4938_v2, 5 }
 0x7eb   :  { %v3017_v49 = vsel %vm2872_vm11, %v3016_v35, %v3015_v24  ;;  %v2905_v44 = vsel %vm2869_vm10, %v2904_v17, %v2903_v20  ;;  %v3064_v43 = vsel %vm2869_vm10, %v3063_v54, %v3062_v45  ;;  %v3065_v36 = vrot.slane %v4918_v12, 6 }
 0x7ec   :  { %v2873_v3 = vsel %vm2872_vm11, %v2871_v40, %v4909_v6  ;;  %v3032_v6 = vsel %vm2872_vm11, %v3031_v31, %v3030_v39  ;;  %v2923_v40 = vrot.slane %v4938_v2, 6  ;;  %v3082_v39 = vrot.slane %v4918_v12, 7 }
 0x7ee   :  { %v2814_v52 = vpop.permute.xlu1 %2813 }
 0x7ef   :  { %v2812_v8 = vpop.permute.xlu0 %2811  ;;  %v4970_v18 = vmul.f32 %v2814_v52, %v4786_v29  ;;  %v2887_v29 = vrot.slane %v4881_v42, 5 }
 0x7f0   :  { %v4978_v37 = vmul.f32 %v2812_v8, %v4789_v50  ;;  %v2889_v50 = vrot.slane %v4938_v2, 4 }
 0x7f1   :  { %v3033_v24 = vrot.slane %v4970_v18, 3  ;;  %v3018_v26 = vrot.slane %v4970_v18, 2  ;;  %v2888_v41 = vsel %vm2869_vm10, %v2887_v29, %v2886_v19  ;;  %v2907_v19 = vsel %vm2872_vm11, %v2906_v38, %v2905_v44 }
 0x7f2   :  { %v2891_v33 = vrot.slane %v4978_v37, 3  ;;  %v2890_v16 = vsel %vm2872_vm11, %v2889_v50, %v2888_v41  ;;  %v2874_v58 = vrot.slane %v4978_v37, 2  ;;  %v2908_v35 = vrot.slane %v4978_v37, 4 }
 0x7f3   :  { %v3019_v57 = vsel %vm2875_vm12, %v3018_v26, %v3017_v49  ;;  %v3034_v32 = vsel %vm2875_vm12, %v3033_v24, %v3032_v6  ;;  %v3049_v49 = vsel %vm2872_vm11, %v3048_v10, %v3047_v61  ;;  %v3067_v60 = vrot.slane %v4970_v18, 5 }
 0x7f4   :  { %v2892_v13 = vsel %vm2875_vm12, %v2891_v33, %v2890_v16  ;;  %v2876_v29 = vsel %vm2875_vm12, %v2874_v58, %v2873_v3  ;;  %v2909_v31 = vsel %vm2875_vm12, %v2908_v35, %v2907_v19  ;;  %v2925_v17 = vrot.slane %v4978_v37, 5 }
 0x7f5   :  { %v3066_v3 = vsel %vm2872_vm11, %v3065_v36, %v3064_v43  ;;  %v2940_v33 = vrot.slane %v4938_v2, 7  ;;  %v3084_v10 = vrot.slane %v4970_v18, 6  ;;  %v3081_v38 = vsel %vm2869_vm10, %v4878_v62, %v4967_v0 }
 0x7f6   :  { %v2818_v5 = vpop.permute.xlu1 %2817  ;;  %v3068_v61 = vsel %vm2875_vm12, %v3067_v60, %v3066_v3  ;;  %v2939_v58 = vsel %vm2869_vm10, %v4881_v42, %v4973_v14  ;;  %v3101_v35 = vrot.slane %v4970_v18, 7  ;;  %v2959_v43 = vrot.slane %v4978_v37, 7 }
 0x7f7   :  { %v4999_v34 = vmul.f32 %v2818_v5, %v4796_v28  ;;  %v2816_v56 = vpop.permute.xlu0 %2815  ;;  %v3115_v19 = vrot.slane %v4878_v62, 2  ;;  %v2973_v60 = vrot.slane %v4881_v42, 2 }
 0x7f8   :  { %v5005_v53 = vmul.f32 %v2816_v56, %v4799_v7  ;;  %v3050_v7 = vrot.slane %v4970_v18, 4  ;;  %v2922_v56 = vsel %vm2869_vm10, %v2921_v55, %v4960_v21  ;;  %v2942_v21 = vrot.slane %v4978_v37, 6 }
 0x7f9   :  { %v3035_v28 = vrot.slane %v4999_v34, 2  ;;  %v3052_v22 = vrot.slane %v4999_v34, 3  ;;  %v3020_v20 = vrot.slane %v4999_v34, 1  ;;  %v3069_v50 = vrot.slane %v4999_v34, 4 }
 0x7fa   :  { %v2893_v48 = vrot.slane %v5005_v53, 2  ;;  %v2910_v8 = vrot.slane %v5005_v53, 3  ;;  %v3051_v15 = vsel %vm2875_vm12, %v3050_v7, %v3049_v49  ;;  %v2927_v5 = vrot.slane %v5005_v53, 4 }
 0x7fb   :  { %v3036_v27 = vsel %vm2878_vm13, %v3035_v28, %v3034_v32  ;;  %v3053_v45 = vsel %vm2878_vm13, %v3052_v22, %v3051_v15  ;;  %v5043_v24 = vsel %vm2878_vm13, %v3020_v20, %v3019_v57  ;;  %v2877_v26 = vrot.slane %v5005_v53, 1 }
 0x7fc   :  { %3037 = vrot.lane.b32.xlu1 %v3036_v27, %s3900_s18  ;;  %v2894_v52 = vsel %vm2878_vm13, %v2893_v48, %v2892_v13  ;;  %v2911_v54 = vsel %vm2878_vm13, %v2910_v8, %v2909_v31  ;;  %v2924_v41 = vsel %vm2872_vm11, %v2923_v40, %v2922_v56  ;;  %v3070_v6 = vsel %vm2878_vm13, %v3069_v50, %v3068_v61 }
 0x7fd   :  { %2895 = vrot.lane.b32.xlu0 %v2894_v52, %s3900_s18  ;;  %v5055_v57 = vsel %vm2878_vm13, %v2877_v26, %v2876_v29  ;;  %v2926_v28 = vsel %vm2875_vm12, %v2925_v17, %v2924_v41  ;;  %v3086_v16 = vrot.slane %v4999_v34, 5  ;;  %v2944_v32 = vrot.slane %v5005_v53, 5 }
 0x7fe   :  { %v2928_v55 = vsel %vm2878_vm13, %v2927_v5, %v2926_v28  ;;  %v3098_v48 = vrot.slane %v4878_v62, 1  ;;  %v3083_v7 = vsel %vm2872_vm11, %v3082_v39, %v3081_v38  ;;  %v2955_v27 = vsel %vm2866_vm9, %v2954_v1, %v4931_v11 }
 0x7ff   :  { %v2956_v13 = vrot.slane %v4881_v42, 1  ;;  %v3085_v0 = vsel %vm2875_vm12, %v3084_v10, %v3083_v7  ;;  %v2941_v22 = vsel %vm2872_vm11, %v2940_v33, %v2939_v58  ;;  %v2988_v52 = vrot.slane %v4843_v9, 4 }
 0x800   :  { %3054 = vrot.lane.b32.xlu1 %v3053_v45, %s3901_s9  ;;  %v3087_v44 = vsel %vm2878_vm13, %v3086_v16, %v3085_v0  ;;  %v2943_v8 = vsel %vm2875_vm12, %v2942_v21, %v2941_v22  ;;  %v3103_v14 = vrot.slane %v4999_v34, 6  ;;  %v3099_v1 = vsel %vm2869_vm10, %v3098_v48, %v4983_v46 }
 0x801   :  { %2912 = vrot.lane.b32.xlu0 %v2911_v54, %s3901_s9  ;;  %v2945_v11 = vsel %vm2878_vm13, %v2944_v32, %v2943_v8  ;;  %v2961_v49 = vrot.slane %v5005_v53, 6  ;;  %v3100_v36 = vsel %vm2872_vm11, %v4918_v12, %v3099_v1  ;;  %v2957_v40 = vsel %vm2869_vm10, %v2956_v13, %v2955_v27 }
 0x802   :  { %v3117_v15 = vrot.slane %v4918_v12, 1  ;;  %v3102_v20 = vsel %vm2875_vm12, %v3101_v35, %v3100_v36  ;;  %v2958_v29 = vsel %vm2872_vm11, %v4938_v2, %v2957_v40  ;;  %v3114_v46 = vsel %vm2866_vm9, %v3113_v25, %v4942_v51 }
 0x803   :  { %v2975_v45 = vrot.slane %v4938_v2, 1  ;;  %v3104_v31 = vsel %vm2878_vm13, %v3103_v14, %v3102_v20  ;;  %v2960_v50 = vsel %vm2875_vm12, %v2959_v43, %v2958_v29  ;;  %v3120_v17 = vrot.slane %v4999_v34, 7 }
 0x804   :  { %3071 = vrot.lane.b32.xlu1 %v3070_v6, %s3902_s20  ;;  %v2972_v54 = vsel %vm2866_vm9, %v2971_v4, %v4947_v63  ;;  %v2962_v5 = vsel %vm2878_vm13, %v2961_v49, %v2960_v50  ;;  %v3116_v26 = vsel %vm2869_vm10, %v3115_v19, %v3114_v46  ;;  %v2978_v51 = vrot.slane %v5005_v53, 7 }
 0x805   :  { %2929 = vrot.lane.b32.xlu0 %v2928_v55, %s3902_s20  ;;  %v3132_v25 = vrot.slane %v4878_v62, 3  ;;  %v3118_v3 = vsel %vm2872_vm11, %v3117_v15, %v3116_v26  ;;  %v2974_v56 = vsel %vm2869_vm10, %v2973_v60, %v2972_v54  ;;  %v3134_v39 = vrot.slane %v4918_v12, 2 }
 0x806   :  { %v2990_v9 = vrot.slane %v4881_v42, 3  ;;  %v3119_v63 = vsel %vm2875_vm12, %v4970_v18, %v3118_v3  ;;  %v2976_v4 = vsel %vm2872_vm11, %v2975_v45, %v2974_v56  ;;  %v3136_v33 = vrot.slane %v4970_v18, 1  ;;  %v3178_v56 = vld [vmem:[%s5171_s10] sm:$0x3] }
 0x807   :  { %v2992_v61 = vrot.slane %v4938_v2, 2  ;;  %v3121_v62 = vsel %vm2878_vm13, %v3120_v17, %v3119_v63  ;;  %v2977_v41 = vsel %vm2875_vm12, %v4978_v37, %v2976_v4  ;;  %v3131_v12 = vsel %vm2866_vm9, %v3130_v47, %v4950_v23 }
 0x808   :  { %3088 = vrot.lane.b32.xlu1 %v3087_v44, %s3903_s21  ;;  %v2994_v42 = vrot.slane %v4978_v37, 1  ;;  %v2979_v10 = vsel %vm2878_vm13, %v2978_v51, %v2977_v41  ;;  %v3133_v18 = vsel %vm2869_vm10, %v3132_v25, %v3131_v12  ;;  %v2989_v2 = vsel %vm2866_vm9, %v2988_v52, %v4953_v30 }
 0x809   :  { %2946 = vrot.lane.b32.xlu0 %v2945_v11, %s3903_s21  ;;  %v3135_v6 = vsel %vm2872_vm11, %v3134_v39, %v3133_v18  ;;  %v2991_v28 = vsel %vm2869_vm10, %v2990_v9, %v2989_v2  ;;  %v3192_v39 = vld [vmem:[%s5172_s11] sm:$0x3] }
 0x80a   :  { %v3137_v59 = vsel %vm2875_vm12, %v3136_v33, %v3135_v6  ;;  %v2993_v23 = vsel %vm2872_vm11, %v2992_v61, %v2991_v28 }
 0x80b   :  { %v3138_v37 = vsel %vm2878_vm13, %v4999_v34, %v3137_v59  ;;  %v2995_v47 = vsel %vm2875_vm12, %v2994_v42, %v2993_v23 }
 0x80c   :  { %3105 = vrot.lane.b32.xlu1 %v3104_v31, %s3904_s3  ;;  %v2996_v16 = vsel %vm2878_vm13, %v5005_v53, %v2995_v47 }
 0x80d   :  { %2963 = vrot.lane.b32.xlu0 %v2962_v5, %s3904_s3  ;;  %v3180_v5 = vlaneseq }
 0x80f   :  { %v3181_v51 = vshrl.u32 %v3180_v5, 7 }
 0x810   :  { %3122 = vrot.lane.b32.xlu1 %v3121_v62, %s3905_s4 }
 0x811   :  { %2980 = vrot.lane.b32.xlu0 %v2979_v10, %s3905_s4  ;;  %v3182_v25 = vsub.s32 0, %v3181_v51  ;;  %v3186_v3 = vsub.s32 1, %v3181_v51 }
 0x813   :  { %v3183_v9 = vrot.slane %v3178_v56, %v3182_v25  ;;  %v3187_v63 = vrot.slane %v3178_v56, %v3186_v3  ;;  %v3197_v33 = vrot.slane %v3192_v39, %v3182_v25  ;;  %v3201_v61 = vrot.slane %v3192_v39, %v3186_v3 }
 0x814   :  { %3139 = vrot.lane.b32.xlu1 %v3138_v37, %s3898_s0 }
 0x815   :  { %2997 = vrot.lane.b32.xlu0 %v2996_v16, %s3898_s0 }
 0x86e   :  { %v3038_v30 = vpop.permute.xlu1 %3037 }
 0x86f   :  { %v2896_v21 = vpop.permute.xlu0 %2895  ;;  %v3155_v13 = vsel %vm609_vm4, %v5043_v24, %v3038_v30 }
 0x870   :  { %v3142_v53 = vsel %vm609_vm4, %v5055_v57, %v2896_v21 }
 0x872   :  { %v3055_v55 = vpop.permute.xlu1 %3054 }
 0x873   :  { %v2913_v38 = vpop.permute.xlu0 %2912  ;;  %v3156_v0 = vsel %vm3143_vm14, %v3155_v13, %v3055_v55 }
 0x874   :  { %v3144_v35 = vsel %vm3143_vm14, %v3142_v53, %v2913_v38 }
 0x876   :  { %v3072_v32 = vpop.permute.xlu1 %3071 }
 0x877   :  { %v2930_v48 = vpop.permute.xlu0 %2929  ;;  %v3157_v52 = vsel %vm3145_vm15, %v3156_v0, %v3072_v32 }
 0x878   :  { %v3146_v8 = vsel %vm3145_vm15, %v3144_v35, %v2930_v48 }
 0x87a   :  { %v3089_v7 = vpop.permute.xlu1 %3088 }
 0x87b   :  { %v2947_v58 = vpop.permute.xlu0 %2946  ;;  %v3158_v14 = vsel %vm3147_vm0, %v3157_v52, %v3089_v7 }
 0x87c   :  { %v3148_v43 = vsel %vm3147_vm0, %v3146_v8, %v2947_v58 }
 0x87e   :  { %v3106_v27 = vpop.permute.xlu1 %3105 }
 0x87f   :  { %v2964_v34 = vpop.permute.xlu0 %2963  ;;  %v3159_v11 = vsel %vm3149_vm1, %v3158_v14, %v3106_v27 }
 0x880   :  { %v3150_v1 = vsel %vm3149_vm1, %v3148_v43, %v2964_v34 }
 0x882   :  { %v3123_v22 = vpop.permute.xlu1 %3122 }
 0x883   :  { %v2981_v44 = vpop.permute.xlu0 %2980  ;;  %v3160_v49 = vsel %vm3151_vm2, %v3159_v11, %v3123_v22 }
 0x884   :  { %v3152_v24 = vsel %vm3151_vm2, %v3150_v1, %v2981_v44 }
 0x886   :  { %v3140_v19 = vpop.permute.xlu1 %3139 }
 0x887   :  { %v3161_v36 = vsel %vm3153_vm3, %v3160_v49, %v3140_v19  ;;  %v2998_v40 = vpop.permute.xlu0 %2997 }
 0x888   :  { %v3154_v15 = vsel %vm3153_vm3, %v3152_v24, %v2998_v40 }
 0x889   :  { %v3162_v57 = vadd.f32 %v3161_v36, %v3154_v15 }
 0x88b   :  { %3163 = vadd.xlane.f32.xlu0 %v3162_v57 }
 0x918   :  { %v3164_v60 = vpop.xlane.xlu0 %3163 }
 0x919   :  { %v3165_v20 = vmul.f32 0.00390625, %v3164_v60 }
 0x91b   :  { %v3166_v29 = vsub.f32 %v3154_v15, %v3165_v20  ;;  %v3167_v46 = vsub.f32 %v3161_v36, %v3165_v20 }
 0x91d   :  { %v3168_v45 = vmul.f32 %v3166_v29, %v3166_v29  ;;  %v3169_v31 = vmul.f32 %v3167_v46, %v3167_v46 }
 0x91f   :  { %v3170_v50 = vadd.f32 %v3169_v31, %v3168_v45 }
 0x921   :  { %3171 = vadd.xlane.f32.xlu1 %v3170_v50 }
 0x9ae   :  { %v3172_v17 = vpop.xlane.xlu1 %3171 }
 0x9af   :  { %v3173_v54 = vmul.f32 0.00390625, %v3172_v17 }
 0x9b1   :  { %v3174_v26 = vadd.f32 1e-05, %v3173_v54 }
 0x9b3   :  { %3895 = vrsqrt.f32 %v3174_v26 }
 0x9bd   :  { %v3896_v4 = vpop.eup %3895 }
 0x9be   :  { %v3176_v62 = vmul.f32 %v3896_v4, %v3166_v29  ;;  %v3177_v41 = vmul.f32 %v3896_v4, %v3167_v46 }
 0x9c0   :  { %v3190_v12 = vmul.f32 %v3183_v9, %v3176_v62  ;;  %v3191_v42 = vmul.f32 %v3187_v63, %v3177_v41 }
 0x9c2   :  { %v3204_v10 = vadd.f32 %v3197_v33, %v3190_v12  ;;  %v3205_v18 = vadd.f32 %v3201_v61, %v3191_v42 }
 0x9c4   :  { %v3208_v2 = vcombine.low %v3204_v10, %v3205_v18  ;;  %v3209_v6 = vcombine.high %v3204_v10, %v3205_v18 }
 0x9c6   :  { %3212 = vst [vmem:[%s5173_s12] sm:$0xff] %v3208_v2  ;;  %3213 = vst [vmem:[%s5173_s12 + $0x8] sm:$0xff] %v3209_v6 }

</bundles_post_ra>
